<compile_context>
chip_gen: v7x
topology: tpu7x:2x2x1
jax: 0.10.0
libtpu: 0.0.40
codegen_flags: <defaults>
</compile_context>

<pallas_src>
import jax
import jax.numpy as jnp
from jax.experimental import pallas as pl
from jax.experimental.pallas import tpu as pltpu

LANE = 128  # pad K and C_out to multiples of the 128-lane vreg width


def _round_up(x, m):
    return ((x + m - 1) // m) * m


# ----------------------------------------------------------------------------
# Pallas kernels
# ----------------------------------------------------------------------------
def _matmul_bias_relu_kernel(p_ref, w_ref, b_ref, o_ref, acc_ref):
    """One (TM, TK) x (TK, C_pad) tile of patches @ W; fused bias + ReLU.

    Grid = (M_tiles, K_tiles); K is the reduction axis (last, "arbitrary").
    acc_ref is a VMEM f32 accumulator that lives across the K loop.
    """
    k = pl.program_id(1)

    @pl.when(k == 0)
    def _():
        acc_ref[...] = jnp.zeros_like(acc_ref)

    acc_ref[...] += jnp.dot(p_ref[...], w_ref[...],
                            preferred_element_type=jnp.float32)

    @pl.when(k == pl.num_programs(1) - 1)
    def _():
        o_ref[...] = jnp.maximum(acc_ref[...] + b_ref[...], 0.0)


def _adaptive_pool2_kernel(x_ref, o_ref):
    """adaptive_avg_pool2d(., 2) for even H, W; NHWC layout, lane-dense C.

    x_ref: (1, H, W, C_pad)  ->  o_ref: (1, 4, C_pad), quadrants in row-major
    (h, w) order, matching torch's (N, C, 2, 2) flattening per channel.
    """
    x = x_ref[...]
    H, W = x.shape[1], x.shape[2]
    H2, W2 = H // 2, W // 2
    q00 = jnp.mean(x[:, :H2, :W2, :], axis=(1, 2))   # (1, C_pad)
    q01 = jnp.mean(x[:, :H2, W2:, :], axis=(1, 2))
    q10 = jnp.mean(x[:, H2:, :W2, :], axis=(1, 2))
    q11 = jnp.mean(x[:, H2:, W2:, :], axis=(1, 2))
    o_ref[...] = jnp.stack([q00, q01, q10, q11], axis=1)   # (1, 4, C_pad)


# ----------------------------------------------------------------------------
# Wrappers around pallas_call
# ----------------------------------------------------------------------------
def conv2d_relu(x_nhwc, layer, *, tm=128):
    """Conv2d (PyTorch semantics) + bias + ReLU as a tiled Pallas matmul.

    x_nhwc may carry extra (zero) padded channels; only the first
    layer['c_in'] channels are used.  Returns an NHWC activation whose channel
    axis is padded to layer C_pad; padded channels are exact zeros
    (zero weights + zero bias + ReLU), so the result can feed both the next
    conv and the lane-dense pool kernel without reshuffling.
    """
    stride, padding = layer["stride"], layer["padding"]
    kh, kw = layer["kh"], layer["kw"]
    c_in = layer["c_in"]
    w_mat, b_row = layer["w_mat"], layer["b_row"]   # (K_pad, C_pad) bf16, (1, C_pad) f32
    K = kh * kw * c_in
    K_pad, C_pad = w_mat.shape

    N, H, W, _ = x_nhwc.shape
    Ho = (H + 2 * padding - kh) // stride + 1
    Wo = (W + 2 * padding - kw) // stride + 1

    # Patch extraction stays in NHWC: shifted strided slices concatenated along
    # the channel axis -- no stack/transpose copies; the (kh, kw, C_in) feature
    # ordering matches the pre-transposed weight matrix built at init time.
    # TODO(synk): a ResNet-scale version should gather patches inside the kernel
    # (implicit GEMM) to avoid the kh*kw activation expansion in HBM.
    xp = jnp.pad(x_nhwc[..., :c_in],
                 ((0, 0), (padding, padding), (padding, padding), (0, 0)))
    cols = [xp[:, i:i + stride * Ho:stride, j:j + stride * Wo:stride, :]
            for i in range(kh) for j in range(kw)]
    patches = jnp.concatenate(cols, axis=-1).astype(jnp.bfloat16)
    patches = patches.reshape(N * Ho * Wo, K)

    M = N * Ho * Wo
    M_pad = _round_up(M, tm)
    patches = jnp.pad(patches, ((0, M_pad - M), (0, K_pad - K)))

    tk = LANE
    grid = (M_pad // tm, K_pad // tk)

    out = pl.pallas_call(
        _matmul_bias_relu_kernel,
        out_shape=jax.ShapeDtypeStruct((M_pad, C_pad), jnp.float32),
        grid_spec=pltpu.PrefetchScalarGridSpec(
            num_scalar_prefetch=0,
            grid=grid,
            in_specs=[
                pl.BlockSpec((tm, tk), lambda i, k: (i, k)),
                pl.BlockSpec((tk, C_pad), lambda i, k: (k, 0)),
                pl.BlockSpec((1, C_pad), lambda i, k: (0, 0)),
            ],
            out_specs=pl.BlockSpec((tm, C_pad), lambda i, k: (i, 0)),
            scratch_shapes=[pltpu.VMEM((tm, C_pad), jnp.float32)],
        ),
        compiler_params=pltpu.CompilerParams(
            dimension_semantics=("parallel", "arbitrary"),
            vmem_limit_bytes=64 * 1024 * 1024,
        ),
        cost_estimate=pl.CostEstimate(
            flops=2 * M_pad * K_pad * C_pad,
            transcendentals=0,
            bytes_accessed=M_pad * K_pad * 2 + K_pad * C_pad * 2
                           + M_pad * C_pad * 4,
        ),
    )(patches, w_mat, b_row)

    return out[:M].reshape(N, Ho, Wo, C_pad)   # NHWC, padded channels == 0


def hook_activation(act_nhwc, c_out):
    """Replicates get_activation(): adaptive_avg_pool2d(., 2) + squeeze + flatten(., 1)."""
    N, H, W, C_pad = act_nhwc.shape
    if H > 2:
        # TODO(synk): torch adaptive_avg_pool2d uses unequal/overlapping bins for
        # odd H/W (e.g. 7x7 ResNet maps); only the even case is implemented.
        assert H % 2 == 0 and W % 2 == 0
        pooled = pl.pallas_call(
            _adaptive_pool2_kernel,
            out_shape=jax.ShapeDtypeStruct((N, 4, C_pad), jnp.float32),
            grid=(N,),
            in_specs=[pl.BlockSpec((1, H, W, C_pad), lambda n: (n, 0, 0, 0))],
            out_specs=pl.BlockSpec((1, 4, C_pad), lambda n: (n, 0, 0)),
            compiler_params=pltpu.CompilerParams(
                dimension_semantics=("parallel",)),
        )(act_nhwc)
        pooled = pooled[:, :, :c_out]                        # (N, 4, C)
        return pooled.transpose(0, 2, 1).reshape(N, c_out * 4)  # channel-major
    else:
        # TODO(synk): torch .squeeze() would also drop a batch dim of 1; this
        # path assumes N > 1 (matches the batch=2 test).
        x = act_nhwc[..., :c_out].transpose(0, 3, 1, 2)
        return x.reshape(N, -1)


# ----------------------------------------------------------------------------
# ModelWrapper equivalent
# ----------------------------------------------------------------------------
def _prepare_conv(w, b, stride, padding):
    """Precompute the padded bf16 weight matrix / f32 bias row at init time."""
    c_out, c_in, kh, kw = w.shape
    K = kh * kw * c_in
    K_pad = _round_up(K, LANE)
    C_pad = _round_up(c_out, LANE)
    # (kh, kw, C_in, C_out) row-major == patch feature ordering used in conv2d_relu.
    w_mat = jnp.transpose(w, (2, 3, 1, 0)).reshape(K, c_out)
    w_mat = jnp.pad(w_mat, ((0, K_pad - K), (0, C_pad - c_out))).astype(jnp.bfloat16)
    b_row = jnp.pad(b.reshape(1, c_out),
                    ((0, 0), (0, C_pad - c_out))).astype(jnp.float32)
    return dict(w_mat=w_mat, b_row=b_row, stride=stride, padding=padding,
                kh=kh, kw=kw, c_in=c_in, c_out=c_out)


def init_params(key):
    k1, k2, k3, k4 = jax.random.split(key, 4)
    raw = {
        "conv1": dict(w=0.1 * jax.random.normal(k1, (8, 4, 3, 3), jnp.float32),
                      b=0.1 * jax.random.normal(k2, (8,), jnp.float32),
                      stride=1, padding=1),
        "conv2": dict(w=0.1 * jax.random.normal(k3, (16, 8, 3, 3), jnp.float32),
                      b=0.1 * jax.random.normal(k4, (16,), jnp.float32),
                      stride=2, padding=1),
    }
    prepared = {name: _prepare_conv(p["w"], p["b"], p["stride"], p["padding"])
                for name, p in raw.items()}
    return raw, prepared


def model_wrapper_forward(params, images_nchw, output_layer_names):
    """ModelWrapper.forward: run the model, hooks capture per-layer activations,
    return {name.replace('.', ''): hooked_activation}."""
    outputs = {}
    x = jnp.transpose(images_nchw, (0, 2, 3, 1))   # NHWC once, at the boundary

    h = conv2d_relu(x, params["conv1"])
    if "conv1" in output_layer_names:
        outputs["conv1"] = hook_activation(h, params["conv1"]["c_out"])

    h = conv2d_relu(h, params["conv2"])
    if "conv2" in output_layer_names:
        outputs["conv2"] = hook_activation(h, params["conv2"]["c_out"])

    return {name.replace(".", ""): outputs[name] for name in output_layer_names}


# ----------------------------------------------------------------------------
# Pure-JAX reference (f32) for a correctness sanity check
# ----------------------------------------------------------------------------
def _reference_forward(raw, images, output_layer_names):
    outs = {}
    h = images
    for name in ("conv1", "conv2"):
        p = raw[name]
        h = jax.lax.conv_general_dilated(
            h, p["w"], window_strides=(p["stride"], p["stride"]),
            padding=[(p["padding"], p["padding"])] * 2,
            dimension_numbers=("NCHW", "OIHW", "NCHW"))
        h = jnp.maximum(h + p["b"][None, :, None, None], 0.0)
        if name in output_layer_names:
            N, C, H, W = h.shape
            pooled = h.reshape(N, C, 2, H // 2, 2, W // 2).mean(axis=(3, 5))
            outs[name] = pooled.reshape(N, C * 4)
    return {n.replace(".", ""): outs[n] for n in output_layer_names}


if __name__ == "__main__":
    key = jax.random.PRNGKey(0)
    pkey, xkey = jax.random.split(key)
    raw_params, params = init_params(pkey)

    # images: NCHW, batch=2, channels=4, spatial=16
    images = jax.random.normal(xkey, (2, 4, 16, 16), jnp.float32)
    output_layer_names = ("conv1", "conv2")

    fwd = jax.jit(lambda x: model_wrapper_forward(params, x, output_layer_names))
    out = fwd(images)
    out = jax.tree_util.tree_map(jax.block_until_ready, out)

    assert out["conv1"].shape == (2, 8 * 4)     # (N, C*2*2)
    assert out["conv2"].shape == (2, 16 * 4)

    # bf16-MXU vs f32 reference: expect ~1e-2 relative accuracy.
    ref = _reference_forward(raw_params, images, output_layer_names)
    for name in out:
        err = float(jnp.max(jnp.abs(out[name] - ref[name])))
        assert err < 5e-2, (name, err)

    print("KERNEL_OK")
</pallas_src>

<mosaic_0001>
module attributes {stable_mosaic.version = 11 : i64} {
  func.func @_matmul_bias_relu_kernel(%arg0: i32, %arg1: i32, %arg2: memref<128x128xbf16, #tpu.memory_space<vmem>>, %arg3: memref<128x128xbf16, #tpu.memory_space<vmem>>, %arg4: memref<1x128xf32, #tpu.memory_space<vmem>>, %arg5: memref<128x128xf32, #tpu.memory_space<vmem>>, %arg6: memref<128x128xf32, #tpu.memory_space<vmem>>) attributes {dimension_semantics = [#tpu.dimension_semantics<parallel>, #tpu.dimension_semantics<arbitrary>], iteration_bounds = array<i64: 4, 1>, scalar_prefetch = 0 : i64, scratch_operands = 1 : i64, tpu.core_type = #tpu.core_type<tc>, window_params = [{transform_indices = @transform_0, window_bounds = array<i64: 128, 128>}, {transform_indices = @transform_1, window_bounds = array<i64: 128, 128>}, {pipeline_mode = #tpu.pipeline_mode<synchronous>, transform_indices = @transform_2, window_bounds = array<i64: 1, 128>}, {transform_indices = @transform_3, window_bounds = array<i64: 128, 128>}]} {
    %c0_i32 = arith.constant 0 : i32
    %0 = arith.cmpi eq, %arg1, %c0_i32 : i32
    %1 = arith.extui %0 : i1 to i32
    %c0_i32_0 = arith.constant 0 : i32
    %2 = arith.cmpi ne, %1, %c0_i32_0 : i32
    scf.if %2 {
      %cst_10 = arith.constant 0.000000e+00 : f32
      %12 = vector.broadcast %cst_10 : f32 to vector<128x128xf32>
      %c0_11 = arith.constant 0 : index
      %c0_12 = arith.constant 0 : index
      %13 = vector.load %arg6[%c0_11, %c0_12] : memref<128x128xf32, #tpu.memory_space<vmem>>, vector<128x128xf32>
      tpu.vector_store %arg6[%c0_11, %c0_12], %12 {strides = array<i32>} : memref<128x128xf32, #tpu.memory_space<vmem>>, vector<128x128xf32>,
    } else {
    }
    %c0 = arith.constant 0 : index
    %c0_1 = arith.constant 0 : index
    %3 = vector.load %arg6[%c0, %c0_1] : memref<128x128xf32, #tpu.memory_space<vmem>>, vector<128x128xf32>
    %c0_2 = arith.constant 0 : index
    %c0_3 = arith.constant 0 : index
    %4 = vector.load %arg2[%c0_2, %c0_3] : memref<128x128xbf16, #tpu.memory_space<vmem>>, vector<128x128xbf16>
    %c0_4 = arith.constant 0 : index
    %c0_5 = arith.constant 0 : index
    %5 = vector.load %arg3[%c0_4, %c0_5] : memref<128x128xbf16, #tpu.memory_space<vmem>>, vector<128x128xbf16>
    %cst = arith.constant dense<0.000000e+00> : vector<128x128xf32>
    %6 = tpu.matmul %4, %5, %cst {dimension_numbers = #tpu.dot_dimension_numbers<[1], [0], [0], [1], [0, 0, 1, 1], [], []>} : vector<128x128xbf16>, vector<128x128xbf16>, vector<128x128xf32> -> vector<128x128xf32>
    %7 = arith.addf %3, %6 : vector<128x128xf32>
    %c0_6 = arith.constant 0 : index
    %c0_7 = arith.constant 0 : index
    %8 = vector.load %arg6[%c0_6, %c0_7] : memref<128x128xf32, #tpu.memory_space<vmem>>, vector<128x128xf32>
    tpu.vector_store %arg6[%c0_6, %c0_7], %7 {strides = array<i32>} : memref<128x128xf32, #tpu.memory_space<vmem>>, vector<128x128xf32>,
    %c0_i32_8 = arith.constant 0 : i32
    %9 = arith.cmpi eq, %arg1, %c0_i32_8 : i32
    %10 = arith.extui %9 : i1 to i32
    %c0_i32_9 = arith.constant 0 : i32
    %11 = arith.cmpi ne, %10, %c0_i32_9 : i32
    scf.if %11 {
      %c0_10 = arith.constant 0 : index
      %c0_11 = arith.constant 0 : index
      %12 = vector.load %arg6[%c0_10, %c0_11] : memref<128x128xf32, #tpu.memory_space<vmem>>, vector<128x128xf32>
      %c0_12 = arith.constant 0 : index
      %c0_13 = arith.constant 0 : index
      %13 = vector.load %arg4[%c0_12, %c0_13] : memref<1x128xf32, #tpu.memory_space<vmem>>, vector<1x128xf32>
      %14 = vector.broadcast %13 : vector<1x128xf32> to vector<128x128xf32>
      %15 = arith.addf %12, %14 : vector<128x128xf32>
      %cst_14 = arith.constant 0.000000e+00 : f32
      %16 = vector.broadcast %cst_14 : f32 to vector<128x128xf32>
      %17 = arith.maximumf %15, %16 : vector<128x128xf32>
      %c0_15 = arith.constant 0 : index
      %c0_16 = arith.constant 0 : index
      %18 = vector.load %arg5[%c0_15, %c0_16] : memref<128x128xf32, #tpu.memory_space<vmem>>, vector<128x128xf32>
      tpu.vector_store %arg5[%c0_15, %c0_16], %17 {strides = array<i32>} : memref<128x128xf32, #tpu.memory_space<vmem>>, vector<128x128xf32>,
    } else {
    }
    return
  }
  func.func @transform_0(%arg0: i32, %arg1: i32) -> (i32, i32) {
    %c0_i32 = arith.constant 0 : i32
    return %arg0, %arg1 : i32, i32
  }
  func.func @transform_1(%arg0: i32, %arg1: i32) -> (i32, i32) {
    %c0_i32 = arith.constant 0 : i32
    %c0_i32_0 = arith.constant 0 : i32
    return %arg1, %c0_i32 : i32, i32
  }
  func.func @transform_2(%arg0: i32, %arg1: i32) -> (i32, i32) {
    %c0_i32 = arith.constant 0 : i32
    %c0_i32_0 = arith.constant 0 : i32
    %c0_i32_1 = arith.constant 0 : i32
    return %c0_i32, %c0_i32_0 : i32, i32
  }
  func.func @transform_3(%arg0: i32, %arg1: i32) -> (i32, i32) {
    %c0_i32 = arith.constant 0 : i32
    %c0_i32_0 = arith.constant 0 : i32
    return %arg0, %c0_i32 : i32, i32
  }
}

module attributes {stable_mosaic.version = 11 : i64} {
  func.func @_adaptive_pool2_kernel(%arg0: i32, %arg1: memref<1x16x16x128xf32, #tpu.memory_space<vmem>>, %arg2: memref<1x4x128xf32, #tpu.memory_space<vmem>>) attributes {dimension_semantics = [#tpu.dimension_semantics<parallel>], iteration_bounds = array<i64: 2>, scalar_prefetch = 0 : i64, scratch_operands = 0 : i64, tpu.core_type = #tpu.core_type<tc>, window_params = [{transform_indices = @transform_0, window_bounds = array<i64: 1, 16, 16, 128>}, {transform_indices = @transform_1, window_bounds = array<i64: 1, 4, 128>}]} {
    %c0 = arith.constant 0 : index
    %c0_0 = arith.constant 0 : index
    %c0_1 = arith.constant 0 : index
    %c0_2 = arith.constant 0 : index
    %0 = vector.load %arg1[%c0, %c0_0, %c0_1, %c0_2] : memref<1x16x16x128xf32, #tpu.memory_space<vmem>>, vector<1x16x16x128xf32>
    %1 = vector.extract_strided_slice %0 {offsets = [0, 0, 0, 0], sizes = [1, 8, 8, 128], strides = [1, 1, 1, 1]} : vector<1x16x16x128xf32> to vector<1x8x8x128xf32>
    %cst = arith.constant dense<0.000000e+00> : vector<1x128xf32>
    %2 = vector.multi_reduction <add>, %1, %cst [1, 2] : vector<1x8x8x128xf32> to vector<1x128xf32>
    %cst_3 = arith.constant 6.400000e+01 : f32
    %3 = vector.broadcast %cst_3 : f32 to vector<1x128xf32>
    %4 = arith.divf %2, %3 : vector<1x128xf32>
    %5 = vector.extract_strided_slice %0 {offsets = [0, 0, 8, 0], sizes = [1, 8, 8, 128], strides = [1, 1, 1, 1]} : vector<1x16x16x128xf32> to vector<1x8x8x128xf32>
    %cst_4 = arith.constant dense<0.000000e+00> : vector<1x128xf32>
    %6 = vector.multi_reduction <add>, %5, %cst_4 [1, 2] : vector<1x8x8x128xf32> to vector<1x128xf32>
    %cst_5 = arith.constant 6.400000e+01 : f32
    %7 = vector.broadcast %cst_5 : f32 to vector<1x128xf32>
    %8 = arith.divf %6, %7 : vector<1x128xf32>
    %9 = vector.extract_strided_slice %0 {offsets = [0, 8, 0, 0], sizes = [1, 8, 8, 128], strides = [1, 1, 1, 1]} : vector<1x16x16x128xf32> to vector<1x8x8x128xf32>
    %cst_6 = arith.constant dense<0.000000e+00> : vector<1x128xf32>
    %10 = vector.multi_reduction <add>, %9, %cst_6 [1, 2] : vector<1x8x8x128xf32> to vector<1x128xf32>
    %cst_7 = arith.constant 6.400000e+01 : f32
    %11 = vector.broadcast %cst_7 : f32 to vector<1x128xf32>
    %12 = arith.divf %10, %11 : vector<1x128xf32>
    %13 = vector.extract_strided_slice %0 {offsets = [0, 8, 8, 0], sizes = [1, 8, 8, 128], strides = [1, 1, 1, 1]} : vector<1x16x16x128xf32> to vector<1x8x8x128xf32>
    %cst_8 = arith.constant dense<0.000000e+00> : vector<1x128xf32>
    %14 = vector.multi_reduction <add>, %13, %cst_8 [1, 2] : vector<1x8x8x128xf32> to vector<1x128xf32>
    %cst_9 = arith.constant 6.400000e+01 : f32
    %15 = vector.broadcast %cst_9 : f32 to vector<1x128xf32>
    %16 = arith.divf %14, %15 : vector<1x128xf32>
    %17 = vector.shape_cast %4 : vector<1x128xf32> to vector<1x1x128xf32>
    %18 = vector.shape_cast %8 : vector<1x128xf32> to vector<1x1x128xf32>
    %19 = vector.shape_cast %12 : vector<1x128xf32> to vector<1x1x128xf32>
    %20 = vector.shape_cast %16 : vector<1x128xf32> to vector<1x1x128xf32>
    %21 = tpu.concatenate %17, %18, %19, %20 in 1 : vector<1x1x128xf32>, vector<1x1x128xf32>, vector<1x1x128xf32>, vector<1x1x128xf32> -> vector<1x4x128xf32>
    %c0_10 = arith.constant 0 : index
    %c0_11 = arith.constant 0 : index
    %c0_12 = arith.constant 0 : index
    %22 = vector.load %arg2[%c0_10, %c0_11, %c0_12] : memref<1x4x128xf32, #tpu.memory_space<vmem>>, vector<1x4x128xf32>
    tpu.vector_store %arg2[%c0_10, %c0_11, %c0_12], %21 {strides = array<i32>} : memref<1x4x128xf32, #tpu.memory_space<vmem>>, vector<1x4x128xf32>,
    return
  }
  func.func @transform_0(%arg0: i32) -> (i32, i32, i32, i32) {
    %c0_i32 = arith.constant 0 : i32
    %c0_i32_0 = arith.constant 0 : i32
    %c0_i32_1 = arith.constant 0 : i32
    %c0_i32_2 = arith.constant 0 : i32
    return %arg0, %c0_i32, %c0_i32_0, %c0_i32_1 : i32, i32, i32, i32
  }
  func.func @transform_1(%arg0: i32) -> (i32, i32, i32) {
    %c0_i32 = arith.constant 0 : i32
    %c0_i32_0 = arith.constant 0 : i32
    %c0_i32_1 = arith.constant 0 : i32
    return %arg0, %c0_i32, %c0_i32_0 : i32, i32, i32
  }
}

module attributes {stable_mosaic.version = 11 : i64} {
  func.func @_matmul_bias_relu_kernel(%arg0: i32, %arg1: i32, %arg2: memref<128x128xbf16, #tpu.memory_space<vmem>>, %arg3: memref<128x128xbf16, #tpu.memory_space<vmem>>, %arg4: memref<1x128xf32, #tpu.memory_space<vmem>>, %arg5: memref<128x128xf32, #tpu.memory_space<vmem>>, %arg6: memref<128x128xf32, #tpu.memory_space<vmem>>) attributes {dimension_semantics = [#tpu.dimension_semantics<parallel>, #tpu.dimension_semantics<arbitrary>], iteration_bounds = array<i64: 1, 1>, scalar_prefetch = 0 : i64, scratch_operands = 1 : i64, tpu.core_type = #tpu.core_type<tc>, window_params = [{transform_indices = @transform_0, window_bounds = array<i64: 128, 128>}, {transform_indices = @transform_1, window_bounds = array<i64: 128, 128>}, {pipeline_mode = #tpu.pipeline_mode<synchronous>, transform_indices = @transform_2, window_bounds = array<i64: 1, 128>}, {transform_indices = @transform_3, window_bounds = array<i64: 128, 128>}]} {
    %c0_i32 = arith.constant 0 : i32
    %0 = arith.cmpi eq, %arg1, %c0_i32 : i32
    %1 = arith.extui %0 : i1 to i32
    %c0_i32_0 = arith.constant 0 : i32
    %2 = arith.cmpi ne, %1, %c0_i32_0 : i32
    scf.if %2 {
      %cst_10 = arith.constant 0.000000e+00 : f32
      %12 = vector.broadcast %cst_10 : f32 to vector<128x128xf32>
      %c0_11 = arith.constant 0 : index
      %c0_12 = arith.constant 0 : index
      %13 = vector.load %arg6[%c0_11, %c0_12] : memref<128x128xf32, #tpu.memory_space<vmem>>, vector<128x128xf32>
      tpu.vector_store %arg6[%c0_11, %c0_12], %12 {strides = array<i32>} : memref<128x128xf32, #tpu.memory_space<vmem>>, vector<128x128xf32>,
    } else {
    }
    %c0 = arith.constant 0 : index
    %c0_1 = arith.constant 0 : index
    %3 = vector.load %arg6[%c0, %c0_1] : memref<128x128xf32, #tpu.memory_space<vmem>>, vector<128x128xf32>
    %c0_2 = arith.constant 0 : index
    %c0_3 = arith.constant 0 : index
    %4 = vector.load %arg2[%c0_2, %c0_3] : memref<128x128xbf16, #tpu.memory_space<vmem>>, vector<128x128xbf16>
    %c0_4 = arith.constant 0 : index
    %c0_5 = arith.constant 0 : index
    %5 = vector.load %arg3[%c0_4, %c0_5] : memref<128x128xbf16, #tpu.memory_space<vmem>>, vector<128x128xbf16>
    %cst = arith.constant dense<0.000000e+00> : vector<128x128xf32>
    %6 = tpu.matmul %4, %5, %cst {dimension_numbers = #tpu.dot_dimension_numbers<[1], [0], [0], [1], [0, 0, 1, 1], [], []>} : vector<128x128xbf16>, vector<128x128xbf16>, vector<128x128xf32> -> vector<128x128xf32>
    %7 = arith.addf %3, %6 : vector<128x128xf32>
    %c0_6 = arith.constant 0 : index
    %c0_7 = arith.constant 0 : index
    %8 = vector.load %arg6[%c0_6, %c0_7] : memref<128x128xf32, #tpu.memory_space<vmem>>, vector<128x128xf32>
    tpu.vector_store %arg6[%c0_6, %c0_7], %7 {strides = array<i32>} : memref<128x128xf32, #tpu.memory_space<vmem>>, vector<128x128xf32>,
    %c0_i32_8 = arith.constant 0 : i32
    %9 = arith.cmpi eq, %arg1, %c0_i32_8 : i32
    %10 = arith.extui %9 : i1 to i32
    %c0_i32_9 = arith.constant 0 : i32
    %11 = arith.cmpi ne, %10, %c0_i32_9 : i32
    scf.if %11 {
      %c0_10 = arith.constant 0 : index
      %c0_11 = arith.constant 0 : index
      %12 = vector.load %arg6[%c0_10, %c0_11] : memref<128x128xf32, #tpu.memory_space<vmem>>, vector<128x128xf32>
      %c0_12 = arith.constant 0 : index
      %c0_13 = arith.constant 0 : index
      %13 = vector.load %arg4[%c0_12, %c0_13] : memref<1x128xf32, #tpu.memory_space<vmem>>, vector<1x128xf32>
      %14 = vector.broadcast %13 : vector<1x128xf32> to vector<128x128xf32>
      %15 = arith.addf %12, %14 : vector<128x128xf32>
      %cst_14 = arith.constant 0.000000e+00 : f32
      %16 = vector.broadcast %cst_14 : f32 to vector<128x128xf32>
      %17 = arith.maximumf %15, %16 : vector<128x128xf32>
      %c0_15 = arith.constant 0 : index
      %c0_16 = arith.constant 0 : index
      %18 = vector.load %arg5[%c0_15, %c0_16] : memref<128x128xf32, #tpu.memory_space<vmem>>, vector<128x128xf32>
      tpu.vector_store %arg5[%c0_15, %c0_16], %17 {strides = array<i32>} : memref<128x128xf32, #tpu.memory_space<vmem>>, vector<128x128xf32>,
    } else {
    }
    return
  }
  func.func @transform_0(%arg0: i32, %arg1: i32) -> (i32, i32) {
    %c0_i32 = arith.constant 0 : i32
    return %arg0, %arg1 : i32, i32
  }
  func.func @transform_1(%arg0: i32, %arg1: i32) -> (i32, i32) {
    %c0_i32 = arith.constant 0 : i32
    %c0_i32_0 = arith.constant 0 : i32
    return %arg1, %c0_i32 : i32, i32
  }
  func.func @transform_2(%arg0: i32, %arg1: i32) -> (i32, i32) {
    %c0_i32 = arith.constant 0 : i32
    %c0_i32_0 = arith.constant 0 : i32
    %c0_i32_1 = arith.constant 0 : i32
    return %c0_i32, %c0_i32_0 : i32, i32
  }
  func.func @transform_3(%arg0: i32, %arg1: i32) -> (i32, i32) {
    %c0_i32 = arith.constant 0 : i32
    %c0_i32_0 = arith.constant 0 : i32
    return %arg0, %c0_i32 : i32, i32
  }
}

module attributes {stable_mosaic.version = 11 : i64} {
  func.func @_adaptive_pool2_kernel(%arg0: i32, %arg1: memref<1x8x8x128xf32, #tpu.memory_space<vmem>>, %arg2: memref<1x4x128xf32, #tpu.memory_space<vmem>>) attributes {dimension_semantics = [#tpu.dimension_semantics<parallel>], iteration_bounds = array<i64: 2>, scalar_prefetch = 0 : i64, scratch_operands = 0 : i64, tpu.core_type = #tpu.core_type<tc>, window_params = [{transform_indices = @transform_0, window_bounds = array<i64: 1, 8, 8, 128>}, {transform_indices = @transform_1, window_bounds = array<i64: 1, 4, 128>}]} {
    %c0 = arith.constant 0 : index
    %c0_0 = arith.constant 0 : index
    %c0_1 = arith.constant 0 : index
    %c0_2 = arith.constant 0 : index
    %0 = vector.load %arg1[%c0, %c0_0, %c0_1, %c0_2] : memref<1x8x8x128xf32, #tpu.memory_space<vmem>>, vector<1x8x8x128xf32>
    %1 = vector.extract_strided_slice %0 {offsets = [0, 0, 0, 0], sizes = [1, 4, 4, 128], strides = [1, 1, 1, 1]} : vector<1x8x8x128xf32> to vector<1x4x4x128xf32>
    %cst = arith.constant dense<0.000000e+00> : vector<1x128xf32>
    %2 = vector.multi_reduction <add>, %1, %cst [1, 2] : vector<1x4x4x128xf32> to vector<1x128xf32>
    %cst_3 = arith.constant 1.600000e+01 : f32
    %3 = vector.broadcast %cst_3 : f32 to vector<1x128xf32>
    %4 = arith.divf %2, %3 : vector<1x128xf32>
    %5 = vector.extract_strided_slice %0 {offsets = [0, 0, 4, 0], sizes = [1, 4, 4, 128], strides = [1, 1, 1, 1]} : vector<1x8x8x128xf32> to vector<1x4x4x128xf32>
    %cst_4 = arith.constant dense<0.000000e+00> : vector<1x128xf32>
    %6 = vector.multi_reduction <add>, %5, %cst_4 [1, 2] : vector<1x4x4x128xf32> to vector<1x128xf32>
    %cst_5 = arith.constant 1.600000e+01 : f32
    %7 = vector.broadcast %cst_5 : f32 to vector<1x128xf32>
    %8 = arith.divf %6, %7 : vector<1x128xf32>
    %9 = vector.extract_strided_slice %0 {offsets = [0, 4, 0, 0], sizes = [1, 4, 4, 128], strides = [1, 1, 1, 1]} : vector<1x8x8x128xf32> to vector<1x4x4x128xf32>
    %cst_6 = arith.constant dense<0.000000e+00> : vector<1x128xf32>
    %10 = vector.multi_reduction <add>, %9, %cst_6 [1, 2] : vector<1x4x4x128xf32> to vector<1x128xf32>
    %cst_7 = arith.constant 1.600000e+01 : f32
    %11 = vector.broadcast %cst_7 : f32 to vector<1x128xf32>
    %12 = arith.divf %10, %11 : vector<1x128xf32>
    %13 = vector.extract_strided_slice %0 {offsets = [0, 4, 4, 0], sizes = [1, 4, 4, 128], strides = [1, 1, 1, 1]} : vector<1x8x8x128xf32> to vector<1x4x4x128xf32>
    %cst_8 = arith.constant dense<0.000000e+00> : vector<1x128xf32>
    %14 = vector.multi_reduction <add>, %13, %cst_8 [1, 2] : vector<1x4x4x128xf32> to vector<1x128xf32>
    %cst_9 = arith.constant 1.600000e+01 : f32
    %15 = vector.broadcast %cst_9 : f32 to vector<1x128xf32>
    %16 = arith.divf %14, %15 : vector<1x128xf32>
    %17 = vector.shape_cast %4 : vector<1x128xf32> to vector<1x1x128xf32>
    %18 = vector.shape_cast %8 : vector<1x128xf32> to vector<1x1x128xf32>
    %19 = vector.shape_cast %12 : vector<1x128xf32> to vector<1x1x128xf32>
    %20 = vector.shape_cast %16 : vector<1x128xf32> to vector<1x1x128xf32>
    %21 = tpu.concatenate %17, %18, %19, %20 in 1 : vector<1x1x128xf32>, vector<1x1x128xf32>, vector<1x1x128xf32>, vector<1x1x128xf32> -> vector<1x4x128xf32>
    %c0_10 = arith.constant 0 : index
    %c0_11 = arith.constant 0 : index
    %c0_12 = arith.constant 0 : index
    %22 = vector.load %arg2[%c0_10, %c0_11, %c0_12] : memref<1x4x128xf32, #tpu.memory_space<vmem>>, vector<1x4x128xf32>
    tpu.vector_store %arg2[%c0_10, %c0_11, %c0_12], %21 {strides = array<i32>} : memref<1x4x128xf32, #tpu.memory_space<vmem>>, vector<1x4x128xf32>,
    return
  }
  func.func @transform_0(%arg0: i32) -> (i32, i32, i32, i32) {
    %c0_i32 = arith.constant 0 : i32
    %c0_i32_0 = arith.constant 0 : i32
    %c0_i32_1 = arith.constant 0 : i32
    %c0_i32_2 = arith.constant 0 : i32
    return %arg0, %c0_i32, %c0_i32_0, %c0_i32_1 : i32, i32, i32, i32
  }
  func.func @transform_1(%arg0: i32) -> (i32, i32, i32) {
    %c0_i32 = arith.constant 0 : i32
    %c0_i32_0 = arith.constant 0 : i32
    %c0_i32_1 = arith.constant 0 : i32
    return %arg0, %c0_i32, %c0_i32_0 : i32, i32, i32
  }
}

</mosaic_0001>

<bundles_post_ra>
// kernel: _lambda_.5
= control target key start
LH: loop header
LB: loop body
LE: loop exit
PB: predicated region body
PF: predicated region fallthrough
CT: control target
= control target key end

     0   :  { %6 = vsyncpa [#allocation3], 0  ;;  %s570_s0 = inlined_call_operand.hbm [shape: f32[2,16,16,128], index: 0, kind: input, shape index: {}]   ;;  %s571_s1 = inlined_call_operand.vmem [shape: f32[2,4,128], index: 1, kind: output, shape index: {}]  }
   0x1   :  { %8 = vsyncpa [#allocation3 + $0x1], 0  ;;  %s428_s6 = smov 0   ;;  %s430_s7 = smov 0  }
   0x2   :  { %s432_s8 = smov 0   ;;  %s434_s9 = smov 0  }
   0x3 LB: > { %s447_s10 = sadd.s32 4294967295, %s413_s9   ;;  %s450_s11 = sadd.s32 1, %s413_s9   ;;  %s413_s9 = sphi %s434_s9, %s578_s9   ;;  %s409_s8 = sphi %s432_s8, %s577_s8   ;;  %s405_s7 = sphi %s430_s7, %s576_s7   ;;  %s401_s6 = sphi %s428_s6, %s575_s6  }
   0x4   : > { %s18_s12 = ssub.s32 %s413_s9, %s450_s11  ;;  %s21_s13 = sadd.s32 1, %s409_s8 }
   0x5   : > { %p19_p0 = scmp.eq.s32.totalorder %s18_s12, 0  ;;  %p28_p1 = scmp.ne.s32.totalorder %s409_s8, %s405_s7 }
   0x6   : > { %p29_p2 = scmp.eq.s32.totalorder %s413_s9, 0  ;;  %p34_p3 = scmp.ne.s32.totalorder %s405_s7, %s401_s6 }
   0x7   : > { %s460_s14 = scalar_select %p19_p0, %s409_s8, %s21_s13  }
   0x8   : > { %p30_p4 = por %p29_p2, %p28_p1  ;;  %p35_p5 = scmp.eq.s32.totalorder %s447_s10, 0 }
   0x9   : > { %p314_p6 = scmp.lt.s32.totalorder %s413_s9, 2  ;;  %s84_s16 = sand.u32 1, %s409_s8  }
   0xa   : > { %p464_p7 = por %p35_p5, %p34_p3  ;;  %s299_s17 = sshll.u32 %s84_s16, 8 }
   0xb   : > { %s307_s18 = sshll.u32 %s413_s9, 12  ;;  %s88_s22 = scalar_lea.vmem [#allocation2], %s299_s17 }
   0xc   : > { %s473_s21 = scalar_lea.hbm %s570_s0, %s307_s18  ;;  %s95_s23 = sshll.u32 %s88_s22, 4  ;;  %s475_s23 = int_to_ptr.vmem [resolvable:$true] %s95_s23 }
   0xd   : > { %p477_p8 = pnand %p314_p6, %p30_p4  ;;  %s482_s25 = scalar_lea.sflag [#allocation3], %s84_s16 }
   0xe   : > { %s349_s26 = scalar_lea.hbm %s473_s21, 4096  ;;  %s354_s29 = scalar_lea.hbm %s570_s0, 8192 }
   0xf   : > { %p350_p10 = scmp.ne.s32.totalorder %s473_s21, %s349_s26  ;;  %p351_p11 = pneg %p477_p8 }
  0x10   : > { %p355_p0 = scmp.lt.u32.totalorder %s473_s21, %s570_s0  ;;  %p356_p1 = scmp.lt.u32.totalorder %s354_s29, %s349_s26 }
  0x11   : > { %p352_p12 = pnand %p351_p11, %p350_p10  ;;  %p358_p3 = scmp.lt.u32.totalorder %s349_s26, %s473_s21 }
  0x12   : > { %p357_p2 = por %p356_p1, %p355_p0 }
  0x13   : > { %p353_p13 = pneg %p352_p12 }
  0x14   : > { %p359_p4 = por %p358_p3, %p357_p2 }
  0x16   : > { %p360_p5 = pnand %p359_p4, %p353_p13 }
  0x18   : > { %363 = shalt.err (!%p360_p5)
}
  0x19   : > { %s364_s3 = scalar_lea.vmem %s475_s23, 4096  ;;  %s415_s4 = smov [#allocation2]  }
  0x1a   : > { %p365_p6 = scmp.ne.s32.totalorder %s475_s23, %s364_s3  ;;  %s369_s5 = sshll.u32 %s415_s4, 4  ;;  %s370_s5 = int_to_ptr.vmem [resolvable:$false] %s369_s5 }
  0x1b   : > { %s371_s6 = scalar_lea.vmem %s370_s5, 8192  ;;  %p372_p9 = scmp.lt.s32.totalorder %s475_s23, %s370_s5 }
  0x1c   : > { %p367_p10 = pnand %p365_p6, %p351_p11  ;;  %p373_p0 = scmp.lt.s32.totalorder %s371_s6, %s364_s3 }
  0x1e   : > { %p368_p12 = pneg %p367_p10  ;;  %p374_p1 = por %p373_p0, %p372_p9 }
  0x20   : > { %p375_p2 = pnand %p374_p1, %p368_p12 }
  0x22   : > { %378 = shalt.err (!%p375_p2)
}
  0x23   : > { %s416_s12 = smov 128   ;;  %s417_s13 = smov 8  }
  0x24   : > { %313 = dma.hbm_to_vmem [thread:$0]  (!%p477_p8), %s473_s21, 4096, %s475_s23, %s482_s25, %s416_s12, %s416_s12, %s417_s13  }
  0x25   : > { %p103_p11 = scmp.lt.s32.totalorder %s413_s9, 3  ;;  %p574_p13 = scmp.ge.s32.totalorder %s413_s9, 1 }
  0x27   : > { %p104_p3 = pnand %p574_p13, %p103_p11 }
  0x28   : > { %s109_s16 = sand.u32 (!%p104_p3), 1, %s405_s7  }
  0x29   : > { %107 = sbr.rel (%p104_p3) target bundleno = 85 (0x55), region = 24  ;;  %s303_s17 = sshll.u32 (!%p104_p3), %s109_s16, 8 }
  0x2a   : > { %s110_s18 = scalar_lea.sflag (!%p104_p3), [#allocation3], %s109_s16  ;;  %s514_s19 = scalar_lea.vmem (!%p104_p3), [#allocation2], %s303_s17 }
  0x30   : > { %396 = dma.done.wait (%p464_p7), %s110_s18, 4096  }
  0x31   : > { %398 = vsyncadd (%p464_p7), %s110_s18, 4294963200  ;;  %v135_v0 = vld [vmem:[%s514_s19] sm:$0xff]  ;;  %v136_v1 = vld [vmem:[%s514_s19 + $0x8] sm:$0xff]  ;;  %p131_p7 = scmp.lt.s32.totalorder %s447_s10, 1  ;;  %vm224_vm0 = vcmask 1040384   ;;  %vm226_vm1 = vcmask 1041408  }
  0x32   : > { %v137_v2 = vld [vmem:[%s514_s19 + $0x10] sm:$0xff]  ;;  %v138_v3 = vld [vmem:[%s514_s19 + $0x18] sm:$0xff]  ;;  %v139_v4 = vld [vmem:[%s514_s19 + $0x20] sm:$0xff]  ;;  %vm228_vm2 = vcmask 1042432  }
  0x33   : > { %v140_v5 = vld [vmem:[%s514_s19 + $0x28] sm:$0xff]  ;;  %v167_v6 = vadd.f32 %v137_v2, %v135_v0  ;;  %v141_v7 = vld [vmem:[%s514_s19 + $0x30] sm:$0xff]  ;;  %v182_v8 = vadd.f32 %v138_v3, %v136_v1  ;;  %v142_v9 = vld [vmem:[%s514_s19 + $0x38] sm:$0xff]  ;;  %s580_s10 = smov (!%p131_p7, %s447_s10), 1 }
  0x34   : > { %v143_v11 = vld [vmem:[%s514_s19 + $0x40] sm:$0xff]  ;;  %v144_v12 = vld [vmem:[%s514_s19 + $0x48] sm:$0xff]  ;;  %v145_v14 = vld [vmem:[%s514_s19 + $0x50] sm:$0xff]  ;;  %s304_s9 = sshll.u32 %s580_s10, 2 }
  0x35   : > { %v168_v10 = vadd.f32 %v167_v6, %v139_v4  ;;  %v183_v13 = vadd.f32 %v182_v8, %v140_v5  ;;  %v151_v15 = vld [vmem:[%s514_s19 + $0x80] sm:$0xff]  ;;  %v152_v16 = vld [vmem:[%s514_s19 + $0x88] sm:$0xff]  ;;  %v153_v18 = vld [vmem:[%s514_s19 + $0x90] sm:$0xff]  ;;  %s134_s21 = scalar_lea.vmem %s571_s1, %s304_s9 }
  0x36   : > { %v154_v19 = vld [vmem:[%s514_s19 + $0x98] sm:$0xff]  ;;  %v155_v20 = vld [vmem:[%s514_s19 + $0xa0] sm:$0xff]  ;;  %v156_v23 = vld [vmem:[%s514_s19 + $0xa8] sm:$0xff]  ;;  %v196_v25 = vadd.f32 %v153_v18, %v151_v15 }
  0x37   : > { %v169_v17 = vadd.f32 %v168_v10, %v141_v7  ;;  %v184_v21 = vadd.f32 %v183_v13, %v142_v9  ;;  %v146_v22 = vld [vmem:[%s514_s19 + $0x58] sm:$0xff]  ;;  %v210_v26 = vadd.f32 %v154_v19, %v152_v16  ;;  %v147_v27 = vld [vmem:[%s514_s19 + $0x60] sm:$0xff]  ;;  %v157_v28 = vld [vmem:[%s514_s19 + $0xb0] sm:$0xff] }
  0x38   : > { %v158_v29 = vld [vmem:[%s514_s19 + $0xb8] sm:$0xff]  ;;  %v148_v31 = vld [vmem:[%s514_s19 + $0x68] sm:$0xff]  ;;  %v197_v33 = vadd.f32 %v196_v25, %v155_v20  ;;  %v149_v35 = vld [vmem:[%s514_s19 + $0x70] sm:$0xff] }
  0x39   : > { %v170_v24 = vadd.f32 %v169_v17, %v143_v11  ;;  %v185_v30 = vadd.f32 %v184_v21, %v144_v12  ;;  %v211_v34 = vadd.f32 %v210_v26, %v156_v23  ;;  %v159_v36 = vld [vmem:[%s514_s19 + $0xc0] sm:$0xff]  ;;  %v160_v37 = vld [vmem:[%s514_s19 + $0xc8] sm:$0xff]  ;;  %v150_v39 = vld [vmem:[%s514_s19 + $0x78] sm:$0xff] }
  0x3a   : > { %v198_v41 = vadd.f32 %v197_v33, %v157_v28  ;;  %v161_v43 = vld [vmem:[%s514_s19 + $0xd0] sm:$0xff]  ;;  %v162_v44 = vld [vmem:[%s514_s19 + $0xd8] sm:$0xff]  ;;  %v163_v49 = vld [vmem:[%s514_s19 + $0xe0] sm:$0xff] }
  0x3b   : > { %v171_v32 = vadd.f32 %v170_v24, %v145_v14  ;;  %v186_v38 = vadd.f32 %v185_v30, %v146_v22  ;;  %v212_v42 = vadd.f32 %v211_v34, %v158_v29  ;;  %v164_v50 = vld [vmem:[%s514_s19 + $0xe8] sm:$0xff]  ;;  %v165_v55 = vld [vmem:[%s514_s19 + $0xf0] sm:$0xff]  ;;  %v166_v56 = vld [vmem:[%s514_s19 + $0xf8] sm:$0xff] }
  0x3c   : > { %v199_v47 = vadd.f32 %v198_v41, %v159_v36 }
  0x3d   : > { %v172_v40 = vadd.f32 %v171_v32, %v147_v27  ;;  %v187_v45 = vadd.f32 %v186_v38, %v148_v31  ;;  %v213_v48 = vadd.f32 %v212_v42, %v160_v37 }
  0x3e   : > { %v200_v53 = vadd.f32 %v199_v47, %v161_v43 }
  0x3f   : > { %v173_v46 = vadd.f32 %v172_v40, %v149_v35  ;;  %v188_v51 = vadd.f32 %v187_v45, %v150_v39  ;;  %v214_v54 = vadd.f32 %v213_v48, %v162_v44 }
  0x40   : > { %v201_v59 = vadd.f32 %v200_v53, %v163_v49 }
  0x41   : > { %v174_v52 = vrot.slane %v173_v46, 4  ;;  %v189_v57 = vrot.slane %v188_v51, 4  ;;  %v215_v60 = vadd.f32 %v214_v54, %v164_v50 }
  0x42   : > { %v202_v63 = vadd.f32 %v201_v59, %v165_v55 }
  0x43   : > { %v175_v58 = vadd.f32 %v174_v52, %v173_v46  ;;  %v190_v61 = vadd.f32 %v189_v57, %v188_v51  ;;  %v216_v0 = vadd.f32 %v215_v60, %v166_v56 }
  0x44   : > { %v203_v3 = vrot.slane %v202_v63, 4 }
  0x45   : > { %v176_v62 = vrot.slane %v175_v58, 2  ;;  %v191_v1 = vrot.slane %v190_v61, 2  ;;  %v217_v4 = vrot.slane %v216_v0, 4 }
  0x46   : > { %v204_v7 = vadd.f32 %v203_v3, %v202_v63 }
  0x47   : > { %v177_v2 = vadd.f32 %v176_v62, %v175_v58  ;;  %v192_v5 = vadd.f32 %v191_v1, %v190_v61  ;;  %v218_v8 = vadd.f32 %v217_v4, %v216_v0 }
  0x48   : > { %v205_v11 = vrot.slane %v204_v7, 2 }
  0x49   : > { %v178_v6 = vrot.slane %v177_v2, 1  ;;  %v193_v9 = vrot.slane %v192_v5, 1  ;;  %v219_v12 = vrot.slane %v218_v8, 2 }
  0x4a   : > { %v206_v14 = vadd.f32 %v205_v11, %v204_v7 }
  0x4b   : > { %v179_v10 = vadd.f32 %v178_v6, %v177_v2  ;;  %v194_v13 = vadd.f32 %v193_v9, %v192_v5  ;;  %v220_v15 = vadd.f32 %v219_v12, %v218_v8 }
  0x4c   : > { %v207_v18 = vrot.slane %v206_v14, 1 }
  0x4d   : > { %v181_v16 = vmul.f32 0.015625, %v179_v10  ;;  %v195_v17 = vmul.f32 0.015625, %v194_v13  ;;  %v221_v19 = vrot.slane %v220_v15, 1 }
  0x4e   : > { %v208_v20 = vadd.f32 %v207_v18, %v206_v14 }
  0x4f   : > { %v222_v21 = vadd.f32 %v221_v19, %v220_v15  ;;  %v225_v22 = vsel %vm224_vm0, %v181_v16, %v195_v17 }
  0x50   : > { %v209_v23 = vmul.f32 0.015625, %v208_v20 }
  0x51   : > { %v223_v24 = vmul.f32 0.015625, %v222_v21 }
  0x52   : > { %v227_v25 = vsel %vm226_vm1, %v225_v22, %v209_v23 }
  0x53   : > { %v229_v26 = vsel %vm228_vm2, %v227_v25, %v223_v24 }
  0x54   : > { %230 = vst [vmem:[%s134_s21] sm:$0xf] %v229_v26 }
  0x55 PF: > { %p11_p8 = scmp.ge.s32.totalorder %s450_s11, 4   ;;  %s575_s6 = smov %s405_s7 }
  0x56   : > { %s576_s7 = smov %s409_s8  ;;  %s577_s8 = smov %s460_s14 }
  0x57   : > { %s578_s9 = smov %s450_s11  ;;  %13 = sbr.rel (!%p11_p8) target bundleno = 3 (0x3), region = 64 }
  0x5e   :  { %250 = vsyncpa [#allocation3], 1 }
  0x5f   :  { %252 = vsyncpa [#allocation3 + $0x1], 1 }

// kernel: _lambda_.4
= control target key start
LH: loop header
LB: loop body
LE: loop exit
PB: predicated region body
PF: predicated region fallthrough
CT: control target
= control target key end

     0   :  { %8 = vsyncpa [#allocation4], 0  ;;  %s1418_s0 = inlined_call_operand.hbm [shape: bf16[512,128], index: 0, kind: input, shape index: {}]   ;;  %s1419_s1 = inlined_call_operand.hbm [shape: bf16[128,128], index: 1, kind: input, shape index: {}]   ;;  %s1420_s2 = inlined_call_operand.hbm [shape: f32[1,128], index: 2, kind: input, shape index: {}]   ;;  %s1421_s3 = inlined_call_operand.hbm [shape: f32[512,128], index: 3, kind: output, shape index: {}]  }
   0x1   :  { %10 = vsyncpa [#allocation4 + $0x1], 0 }
   0x2   :  { %11 = vsyncpa [#allocation7], 0 }
   0x3   :  { %12 = vsyncpa [#allocation5], 0 }
   0x4   :  { %14 = vsyncpa [#allocation5 + $0x1], 0  ;;  %s1135_s12 = smov 0   ;;  %s1137_s13 = smov 0  }
   0x5   :  { %s1139_s14 = smov 0   ;;  %s1141_s15 = smov 0  }
   0x6   :  { %s1143_s16 = smov 0   ;;  %s1145_s17 = smov 0  }
   0x7 LB: > { %s728_s18 = sadd.s32 4294967295, %s1105_s17   ;;  %s729_s19 = sadd.s32 4294967294, %s1105_s17   ;;  %s1105_s17 = sphi %s1145_s17, %s20_s17   ;;  %s1101_s16 = sphi %s1143_s16, %s1443_s16   ;;  %s1097_s15 = sphi %s1141_s15, %s1442_s15   ;;  %s1093_s14 = sphi %s1139_s14, %s1441_s14   ;;  %s1089_s13 = sphi %s1137_s13, %s1440_s13   ;;  %s1085_s12 = sphi %s1135_s12, %s1439_s12  }
   0x8   : > { %p54_p0 = scmp.ne.s32.totalorder %s1089_s13, %s1085_s12  ;;  %p1169_p1 = scmp.eq.s32.totalorder %s728_s18, 0 }
   0x9   : > { %p1173_p2 = scmp.eq.s32.totalorder %s728_s18, 3  ;;  %p131_p3 = scmp.eq.s32.totalorder %s729_s19, 3 }
   0xa   : > { %s1426_s20 = scalar_select %p1169_p1, 1, 0 }
   0xb   : > { %s1427_s21 = scalar_select %p1173_p2, 1, 0 }
   0xc   : > { %p1179_p4 = por %p1169_p1, %p54_p0  ;;  %p730_p5 = scmp.ge.s32.totalorder %s1105_s17, 1 }
   0xd   : > { %p1184_p6 = por %p131_p3, %p54_p0  ;;  %p138_p7 = scmp.lt.s32.totalorder %s1105_s17, 5 }
   0xe   : > { %s1428_s22 = scalar_select %p1179_p4, 1, 0 }
   0xf   : > { %s1429_s23 = scalar_select %p1184_p6, 1, 0 }
  0x10   : > { %p1189_p8 = pnand %p730_p5, %p138_p7  ;;  %s1107_s25 = smov [#allocation6]  }
  0x11   : > { %s153_s26 = sshll.u32 %s1107_s25, 4  ;;  %s1108_s28 = smov [#allocation8]   ;;  %s154_s26 = int_to_ptr.vmem [resolvable:$true] %s153_s26 }
  0x12   : > { %s1430_s24 = scalar_select %p1189_p8, 1, 0 }
  0x13   : > { %p842_p9 = pneg %p1189_p8  ;;  %s167_s29 = sshll.u32 %s1108_s28, 4  ;;  %s1201_s29 = int_to_ptr.vmem [resolvable:$true] %s167_s29 }
  0x14   : > { %s933_s5 = scalar_lea.hbm %s1419_s1, 1024 }
  0x15   : > { %p1197_p10 = pnand %p842_p9, %p1169_p1  ;;  %p934_p11 = scmp.ne.s32.totalorder %s1419_s1, %s933_s5 }
  0x16   : > { %p940_p3 = scmp.lt.u32.totalorder %s933_s5, %s1419_s1 }
  0x17   : > { %p935_p12 = pneg %p1197_p10 }
  0x19   : > { %p936_p13 = pnand %p935_p12, %p934_p11 }
  0x1b   : > { %p937_p0 = pneg %p936_p13 }
  0x1d   : > { %p942_p5 = pnand %p940_p3, %p937_p0 }
  0x1f   : > { %945 = shalt.err (!%p942_p5)
}
  0x20   : > { %s946_s10 = scalar_lea.vmem %s154_s26, 1024  ;;  %p954_p1 = scmp.lt.s32.totalorder %s154_s26, %s154_s26 }
  0x21   : > { %p947_p7 = scmp.ne.s32.totalorder %s154_s26, %s946_s10  ;;  %p955_p4 = scmp.lt.s32.totalorder %s946_s10, %s946_s10 }
  0x23   : > { %p949_p9 = pnand %p947_p7, %p935_p12  ;;  %p956_p8 = por %p955_p4, %p954_p1 }
  0x25   : > { %p950_p6 = pneg %p949_p9 }
  0x27   : > { %p957_p2 = pnand %p956_p8, %p950_p6 }
  0x29   : > { %960 = shalt.err (!%p957_p2)
}
  0x2a   : > { %s1109_s11 = smov 64   ;;  %s1110_s18 = smov 4  }
  0x2b   : > { %845 = dma.hbm_to_vmem [thread:$0]  (!%p1197_p10), %s1419_s1, 1024, %s154_s26, [#allocation7], %s1109_s11, %s1109_s11, %s1110_s18  }
  0x2c   : > { %s961_s4 = scalar_lea.hbm %s1420_s2, 16 }
  0x2d   : > { %p962_p1 = scmp.ne.s32.totalorder %s1420_s2, %s961_s4  ;;  %p968_p6 = scmp.lt.u32.totalorder %s961_s4, %s1420_s2 }
  0x2f   : > { %p964_p2 = pnand %p962_p1, %p935_p12 }
  0x31   : > { %p965_p4 = pneg %p964_p2 }
  0x33   : > { %p970_p8 = pnand %p968_p6, %p965_p4 }
  0x35   : > { %973 = shalt.err (!%p970_p8)
}
  0x36   : > { %s974_s26 = scalar_lea.vmem %s1201_s29, 16  ;;  %s981_s9 = scalar_lea.vmem %s1201_s29, 32 }
  0x37   : > { %p975_p11 = scmp.ne.s32.totalorder %s1201_s29, %s974_s26  ;;  %p982_p3 = scmp.lt.s32.totalorder %s1201_s29, %s1201_s29 }
  0x38   : > { %p983_p5 = scmp.lt.s32.totalorder %s981_s9, %s974_s26 }
  0x39   : > { %p977_p13 = pnand %p975_p11, %p935_p12 }
  0x3a   : > { %p984_p7 = por %p983_p5, %p982_p3 }
  0x3b   : > { %p978_p0 = pneg %p977_p13 }
  0x3d   : > { %p985_p9 = pnand %p984_p7, %p978_p0 }
  0x3f   : > { %988 = shalt.err (!%p985_p9)
}
  0x40   : > { %848 = dma.hbm_to_vmem [thread:$0]  (!%p1197_p10), %s1420_s2, 16, %s1201_s29, [#allocation7]  }
  0x41   : > { %s32_s25 = sadd.s32 1, %s1101_s16  ;;  %s41_s28 = sadd.s32 1, %s1093_s14 }
  0x42   : > { %p34_p12 = scmp.ge.s32.totalorder %s32_s25, 4  ;;  %p48_p1 = scmp.ne.s32.totalorder %s1093_s14, %s1089_s13 }
  0x43   : > { %p49_p2 = scmp.eq.s32.totalorder %s1105_s17, 0  ;;  %p859_p4 = scmp.lt.s32.totalorder %s1105_s17, 4 }
  0x44   : > { %s1445_s25 = smov (%p34_p12, %s32_s25), 0  ;;  %p1432_p8 = scmp.ne.s32.totalorder %s1427_s21, 0 }
  0x45   : > { %p50_p6 = por %p49_p2, %p48_p1  ;;  %s36_s30 = ssub.s32 %s1101_s16, %s1445_s25 }
  0x46   : > { %p1264_p11 = por %p1432_p8, %p48_p1  ;;  %s178_s4 = sand.u32 1, %s1093_s14  }
  0x47   : > { %p39_p13 = scmp.eq.s32.totalorder %s36_s30, 0  ;;  %s734_s29 = sshll.u32 %s178_s4, 6 }
  0x48   : > { %s764_s5 = sshll.u32 %s1101_s16, 10  ;;  %s182_s21 = scalar_lea.vmem [#allocation3], %s734_s29 }
  0x49   : > { %s1273_s6 = scalar_select %p39_p13, %s1093_s14, %s41_s28  }
  0x4a   : > { %s1278_s26 = scalar_lea.hbm %s1418_s0, %s764_s5  ;;  %s190_s9 = sshll.u32 %s182_s21, 4  ;;  %s1286_s9 = int_to_ptr.vmem [resolvable:$true] %s190_s9 }
  0x4b   : > { %p1282_p10 = pnand %p859_p4, %p50_p6  ;;  %s1288_s19 = scalar_lea.sflag [#allocation4], %s178_s4 }
  0x4c   : > { %s989_s28 = scalar_lea.hbm %s1278_s26, 1024  ;;  %s994_s5 = scalar_lea.hbm %s1418_s0, 4096 }
  0x4d   : > { %p990_p0 = scmp.ne.s32.totalorder %s1278_s26, %s989_s28  ;;  %p991_p3 = pneg %p1282_p10 }
  0x4e   : > { %p995_p9 = scmp.lt.u32.totalorder %s1278_s26, %s1418_s0  ;;  %p996_p12 = scmp.lt.u32.totalorder %s994_s5, %s989_s28 }
  0x4f   : > { %p992_p5 = pnand %p991_p3, %p990_p0  ;;  %p998_p2 = scmp.lt.u32.totalorder %s989_s28, %s1278_s26 }
  0x50   : > { %p997_p1 = por %p996_p12, %p995_p9 }
  0x51   : > { %p993_p7 = pneg %p992_p5 }
  0x52   : > { %p999_p4 = por %p998_p2, %p997_p1 }
  0x54   : > { %p1000_p6 = pnand %p999_p4, %p993_p7 }
  0x56   : > { %1003 = shalt.err (!%p1000_p6)
}
  0x57   : > { %s1004_s4 = scalar_lea.vmem %s1286_s9, 1024  ;;  %s1111_s21 = smov [#allocation3]  }
  0x58   : > { %p1005_p8 = scmp.ne.s32.totalorder %s1286_s9, %s1004_s4  ;;  %s1009_s30 = sshll.u32 %s1111_s21, 4  ;;  %s1010_s30 = int_to_ptr.vmem [resolvable:$false] %s1009_s30 }
  0x59   : > { %s1011_s29 = scalar_lea.vmem %s1010_s30, 2048  ;;  %p1012_p5 = scmp.lt.s32.totalorder %s1286_s9, %s1010_s30 }
  0x5a   : > { %p1007_p13 = pnand %p1005_p8, %p991_p3  ;;  %p1013_p9 = scmp.lt.s32.totalorder %s1011_s29, %s1004_s4 }
  0x5c   : > { %p1008_p0 = pneg %p1007_p13  ;;  %p1014_p12 = por %p1013_p9, %p1012_p5 }
  0x5e   : > { %p1015_p1 = pnand %p1014_p12, %p1008_p0 }
  0x60   : > { %1018 = shalt.err (!%p1015_p1)
}
  0x61   : > { %852 = dma.hbm_to_vmem [thread:$0]  (!%p1282_p10), %s1278_s26, 1024, %s1286_s9, %s1288_s19, %s1109_s11, %s1109_s11, %s1110_s18  }
  0x62   : > { %p1435_p3 = scmp.ne.s32.totalorder %s1430_s24, 0 }
  0x63   : > { %s1322_s28 = sand.u32 (!%p1435_p3), 1, %s1089_s13   ;;  %p1436_p7 = scmp.ne.s32.totalorder (!%p1435_p3), %s1428_s22, 0 }
  0x64   : > { %202 = sbr.rel (%p1435_p3) target bundleno = 386 (0x182), region = 32  ;;  %s738_s5 = sshll.u32 (!%p1435_p3), %s1322_s28, 6 }
  0x65   : > { %s205_s7 = scalar_lea.sflag (!%p1435_p3), [#allocation4], %s1322_s28  ;;  %s1326_s8 = scalar_lea.vmem (!%p1435_p3), [#allocation3], %s738_s5 }
  0x6b   : > { %1072 = dma.done.wait (%p1436_p7), %s205_s7, 1024  }
  0x6c   : > { %1074 = vsyncadd (%p1436_p7), %s205_s7, 4294966272  ;;  %p1437_p10 = scmp.ne.s32.totalorder %s1426_s20, 0 }
  0x6e   : > { %1076 = dma.done.wait (%p1437_p10), [#allocation7], 1040  }
  0x6f   : > { %1078 = vsyncadd (%p1437_p10), [#allocation7], 4294966256  ;;  %v917_v0 = vld [vmem:[#allocation6] sm:$0xff]   ;;  %v918_v1 = vld [vmem:[#allocation6 + $0x8] sm:$0xff]   ;;  %s741_s20 = sshll.u32 %s1322_s28, 7  ;;  %s765_s24 = sshll.u32 %s1097_s15, 11 }
  0x70   : > { %782 = vmatprep.subr.bf16.mxu0 %v917_v0  ;;  %814 = vmatprep.subr.bf16.mxu1 %v917_v0  ;;  %v919_v2 = vld [vmem:[#allocation6 + $0x10] sm:$0xff]   ;;  %v920_v3 = vld [vmem:[#allocation6 + $0x18] sm:$0xff]   ;;  %v925_v4 = vld [vmem:[%s1326_s8] sm:$0xff]   ;;  %s1345_s22 = scalar_lea.vmem [#allocation9], %s741_s20  ;;  %s1362_s26 = scalar_lea.hbm %s1421_s3, %s765_s24 }
  0x71   : > { %783 = vmatpush3.bf16.msra.mxu0 %v917_v0  ;;  %822 = vmatpush3.bf16.msra.mxu1 %v917_v0  ;;  %v926_v5 = vld [vmem:[%s1326_s8 + $0x20] sm:$0xff]   ;;  %v922_v7 = vld [vmem:[#allocation6 + $0x28] sm:$0xff]   ;;  %v923_v8 = vld [vmem:[#allocation6 + $0x30] sm:$0xff]   ;;  %s624_s11 = sshll.u32 %s1345_s22, 4  ;;  %s611_s9 = scalar_lea.sflag [#allocation5], %s1322_s28  ;;  %s1364_s11 = int_to_ptr.vmem [resolvable:$true] %s624_s11 }
  0x72   : > { %784 = vmatprep.subr.bf16.mxu0 %v918_v1  ;;  %815 = vmatprep.subr.bf16.mxu1 %v918_v1  ;;  %v921_v6 = vld [vmem:[#allocation6 + $0x20] sm:$0xff]   ;;  %v924_v9 = vld [vmem:[#allocation6 + $0x38] sm:$0xff]   ;;  %v927_v10 = vld [vmem:[%s1326_s8 + $0x8] sm:$0xff]   ;;  %s1019_s10 = scalar_lea.vmem %s1364_s11, 2048  ;;  %s1112_s19 = smov [#allocation9]  }
  0x73   : > { %798 = vmatprep.mubr.bf16.mxu0 %v925_v4  ;;  %806 = vmatprep.mubr.bf16.mxu1 %v926_v5  ;;  %v928_v11 = vld [vmem:[%s1326_s8 + $0x28] sm:$0xff]   ;;  %v929_v12 = vld [vmem:[%s1326_s8 + $0x10] sm:$0xff]   ;;  %v931_v14 = vld [vmem:[%s1326_s8 + $0x18] sm:$0xff]   ;;  %p1020_p2 = scmp.ne.s32.totalorder %s1364_s11, %s1019_s10  ;;  %s1023_s4 = sshll.u32 %s1112_s19, 4  ;;  %s1024_s4 = int_to_ptr.vmem [resolvable:$false] %s1023_s4 }
  0x74   : > { %v930_v13 = vld [vmem:[%s1326_s8 + $0x30] sm:$0xff]   ;;  %v932_v15 = vld [vmem:[%s1326_s8 + $0x38] sm:$0xff]   ;;  %v758_v16 = vld [vmem:[#allocation8] ss:$0 sm:$0xff]  ;;  %s1025_s21 = scalar_lea.vmem %s1024_s4, 4096  ;;  %p1026_p8 = scmp.lt.s32.totalorder %s1364_s11, %s1024_s4 }
  0x75   : > { %785 = vmatpush3.bf16.msra.mxu0 %v918_v1  ;;  %823 = vmatpush3.bf16.msra.mxu1 %v918_v1  ;;  %p1021_p4 = pnand %p1020_p2, %p1264_p11  ;;  %p1027_p13 = scmp.lt.s32.totalorder %s1025_s21, %s1019_s10 }
  0x76   : > { %786 = vmatprep.subr.bf16.mxu0 %v919_v2  ;;  %816 = vmatprep.subr.bf16.mxu1 %v919_v2 }
  0x77   : > { %p1022_p6 = pneg %p1021_p4  ;;  %p1028_p0 = por %p1027_p13, %p1026_p8 }
  0x79   : > { %787 = vmatpush3.bf16.msra.mxu0 %v919_v2  ;;  %824 = vmatpush3.bf16.msra.mxu1 %v919_v2  ;;  %p1029_p5 = pnand %p1028_p0, %p1022_p6 }
  0x7a   : > { %788 = vmatprep.subr.bf16.mxu0 %v920_v3  ;;  %817 = vmatprep.subr.bf16.mxu1 %v920_v3 }
  0x7d   : > { %789 = vmatpush3.bf16.msra.mxu0 %v920_v3  ;;  %825 = vmatpush3.bf16.msra.mxu1 %v920_v3 }
  0x7e   : > { %790 = vmatprep.subr.bf16.mxu0 %v921_v6  ;;  %818 = vmatprep.subr.bf16.mxu1 %v921_v6 }
  0x81   : > { %791 = vmatpush3.bf16.msra.mxu0 %v921_v6  ;;  %826 = vmatpush3.bf16.msra.mxu1 %v921_v6 }
  0x82   : > { %792 = vmatprep.subr.bf16.mxu0 %v922_v7  ;;  %819 = vmatprep.subr.bf16.mxu1 %v922_v7 }
  0x85   : > { %793 = vmatpush3.bf16.msra.mxu0 %v922_v7  ;;  %827 = vmatpush3.bf16.msra.mxu1 %v922_v7 }
  0x86   : > { %794 = vmatprep.subr.bf16.mxu0 %v923_v8  ;;  %820 = vmatprep.subr.bf16.mxu1 %v923_v8 }
  0x89   : > { %795 = vmatpush3.bf16.msra.mxu0 %v923_v8  ;;  %828 = vmatpush3.bf16.msra.mxu1 %v923_v8 }
  0x8a   : > { %796 = vmatprep.subr.bf16.mxu0 %v924_v9  ;;  %821 = vmatprep.subr.bf16.mxu1 %v924_v9 }
  0x8d   : > { %797 = vmatpush3.bf16.msra.mxu0 %v924_v9  ;;  %829 = vmatpush3.bf16.msra.mxu1 %v924_v9 }
  0x90   : > { %799 = vmatmul.mubr.bf16.vlgmr.msra.gmra.mrb[0].mxu0 %v927_v10  ;;  %807 = vmatmul.mubr.bf16.vlgmr.msra.gmra.mrb[0].mxu1 %v928_v11 }
  0x91   : > { %802 = vmatprep.mubr.bf16.mxu0 %v929_v12  ;;  %810 = vmatprep.mubr.bf16.mxu1 %v930_v13 }
  0x98   : > { %803 = vmatmul.mubr.bf16.gmra.mrb[4].mxu0 %v931_v14  ;;  %811 = vmatmul.mubr.bf16.gmra.mrb[4].mxu1 %v932_v15 }
 0x163   : > { %v800_v17 = vpop.f32.mrb[0].mxu0  ;;  %v808_v18 = vpop.f32.mrb[0].mxu1 }
 0x164   : > { %v564_v19 = vadd.f32 %v800_v17, %v758_v16  ;;  %v572_v20 = vadd.f32 %v808_v18, %v758_v16  ;;  %v441_v21 = vpop.f32.mrb[1].mxu0  ;;  %v473_v22 = vpop.f32.mrb[1].mxu1 }
 0x165   : > { %v562_v23 = vadd.f32 %v758_v16, %v441_v21  ;;  %v570_v24 = vadd.f32 %v758_v16, %v473_v22  ;;  %v801_v25 = vpop.f32.mrb[2].mxu0  ;;  %v809_v26 = vpop.f32.mrb[2].mxu1 }
 0x166   : > { %v580_v27 = vmax.f32 %v564_v19, 0.0  ;;  %v588_v28 = vmax.f32 %v572_v20, 0.0  ;;  %v565_v29 = vadd.f32 %v801_v25, %v758_v16  ;;  %v573_v30 = vadd.f32 %v809_v26, %v758_v16  ;;  %v444_v31 = vpop.f32.mrb[3].mxu0  ;;  %v476_v32 = vpop.f32.mrb[3].mxu1 }
 0x167   : > { %v578_v33 = vmax.f32 %v562_v23, 0.0  ;;  %v586_v34 = vmax.f32 %v570_v24, 0.0  ;;  %v563_v35 = vadd.f32 %v758_v16, %v444_v31  ;;  %v571_v36 = vadd.f32 %v758_v16, %v476_v32 }
 0x168   : > { %596 = vst [vmem:[%s1345_s22 + $0x10] sm:$0xff] %v580_v27  ;;  %604 = vst [vmem:[%s1345_s22 + $0x50] sm:$0xff] %v588_v28  ;;  %v581_v37 = vmax.f32 %v565_v29, 0.0  ;;  %v589_v38 = vmax.f32 %v573_v30, 0.0 }
 0x169   : > { %594 = vst [vmem:[%s1345_s22] sm:$0xff] %v578_v33  ;;  %602 = vst [vmem:[%s1345_s22 + $0x40] sm:$0xff] %v586_v34  ;;  %v579_v39 = vmax.f32 %v563_v35, 0.0  ;;  %v587_v40 = vmax.f32 %v571_v36, 0.0 }
 0x16a   : > { %597 = vst [vmem:[%s1345_s22 + $0x18] sm:$0xff] %v581_v37  ;;  %605 = vst [vmem:[%s1345_s22 + $0x58] sm:$0xff] %v589_v38 }
 0x16b   : > { %595 = vst [vmem:[%s1345_s22 + $0x8] sm:$0xff] %v579_v39  ;;  %603 = vst [vmem:[%s1345_s22 + $0x48] sm:$0xff] %v587_v40  ;;  %v804_v41 = vpop.f32.mrb[4].mxu0  ;;  %v812_v42 = vpop.f32.mrb[4].mxu1 }
 0x16c   : > { %v568_v43 = vadd.f32 %v804_v41, %v758_v16  ;;  %v576_v44 = vadd.f32 %v812_v42, %v758_v16  ;;  %v457_v45 = vpop.f32.mrb[5].mxu0  ;;  %v489_v46 = vpop.f32.mrb[5].mxu1 }
 0x16d   : > { %v566_v47 = vadd.f32 %v758_v16, %v457_v45  ;;  %v574_v48 = vadd.f32 %v758_v16, %v489_v46  ;;  %v805_v49 = vpop.f32.mrb[6].mxu0  ;;  %v813_v50 = vpop.f32.mrb[6].mxu1 }
 0x16e   : > { %v584_v51 = vmax.f32 %v568_v43, 0.0  ;;  %v592_v52 = vmax.f32 %v576_v44, 0.0  ;;  %v569_v53 = vadd.f32 %v805_v49, %v758_v16  ;;  %v577_v54 = vadd.f32 %v813_v50, %v758_v16  ;;  %v460_v55 = vpop.f32.mrb[7].mxu0  ;;  %v492_v56 = vpop.f32.mrb[7].mxu1 }
 0x16f   : > { %v582_v57 = vmax.f32 %v566_v47, 0.0  ;;  %v590_v58 = vmax.f32 %v574_v48, 0.0  ;;  %v567_v59 = vadd.f32 %v758_v16, %v460_v55  ;;  %v575_v60 = vadd.f32 %v758_v16, %v492_v56 }
 0x170   : > { %600 = vst [vmem:[%s1345_s22 + $0x30] sm:$0xff] %v584_v51  ;;  %608 = vst [vmem:[%s1345_s22 + $0x70] sm:$0xff] %v592_v52  ;;  %v585_v61 = vmax.f32 %v569_v53, 0.0  ;;  %v593_v62 = vmax.f32 %v577_v54, 0.0 }
 0x171   : > { %598 = vst [vmem:[%s1345_s22 + $0x20] sm:$0xff] %v582_v57  ;;  %606 = vst [vmem:[%s1345_s22 + $0x60] sm:$0xff] %v590_v58  ;;  %v583_v63 = vmax.f32 %v567_v59, 0.0  ;;  %v591_v0 = vmax.f32 %v575_v60, 0.0 }
 0x172   : > { %601 = vst [vmem:[%s1345_s22 + $0x38] sm:$0xff] %v585_v61  ;;  %609 = vst [vmem:[%s1345_s22 + $0x78] sm:$0xff] %v593_v62 }
 0x173   : > { %599 = vst [vmem:[%s1345_s22 + $0x28] sm:$0xff] %v583_v63  ;;  %607 = vst [vmem:[%s1345_s22 + $0x68] sm:$0xff] %v591_v0 }
 0x174   : > { %1032 = shalt.err (!%p1029_p5)
}
 0x175   : > { %s1033_s30 = scalar_lea.hbm %s1362_s26, 2048  ;;  %s1037_s7 = scalar_lea.hbm %s1421_s3, 8192 }
 0x176   : > { %p1034_p9 = scmp.ne.s32.totalorder %s1362_s26, %s1033_s30  ;;  %p1038_p3 = scmp.lt.u32.totalorder %s1362_s26, %s1421_s3 }
 0x177   : > { %p1039_p7 = scmp.lt.u32.totalorder %s1037_s7, %s1033_s30  ;;  %p1041_p2 = scmp.lt.u32.totalorder %s1033_s30, %s1362_s26 }
 0x178   : > { %p1035_p12 = pnand %p1034_p9, %p1264_p11 }
 0x179   : > { %p1040_p10 = por %p1039_p7, %p1038_p3 }
 0x17a   : > { %p1036_p1 = pneg %p1035_p12 }
 0x17b   : > { %p1042_p4 = por %p1041_p2, %p1040_p10 }
 0x17d   : > { %p1043_p6 = pnand %p1042_p4, %p1036_p1 }
 0x17f   : > { %1046 = shalt.err (!%p1043_p6)
}
 0x180   : > { %s1113_s22 = smov 128   ;;  %s1114_s24 = smov 8  }
 0x181   : > { %840 = dma.vmem_to_hbm [thread:$0]  (%p1264_p11), %s1364_s11, 2048, %s1362_s26, %s611_s9, %s1113_s22, %s1113_s22, %s1114_s24  }
 0x182 PF: > { %p862_p8 = scmp.ge.s32.totalorder %s1105_s17, 2  ;;  %s639_s15 = sand.u32 1, %s1085_s12  }
 0x183   : > { %p1438_p13 = scmp.ne.s32.totalorder %s1429_s23, 0  ;;  %s640_s18 = scalar_lea.sflag [#allocation5], %s639_s15 }
 0x185   : > { %p854_p0 = pnand %p862_p8, %p1438_p13 }
 0x187   : > { %1080 = dma.done.wait (!%p854_p0), %s640_s18, 2048  }
 0x188   : > { %1082 = vsyncadd (!%p854_p0), %s640_s18, 4294965248  ;;  %s20_s17 = sadd.s32 1, %s1105_s17   ;;  %s1439_s12 = smov %s1089_s13 }
 0x189   : > { %p17_p5 = scmp.ge.s32.totalorder %s20_s17, 6   ;;  %s1440_s13 = smov %s1093_s14 }
 0x18a   : > { %s1441_s14 = smov %s1273_s6  ;;  %s1442_s15 = smov %s1101_s16 }
 0x18b   : > { %s1443_s16 = smov %s1445_s25  ;;  %19 = sbr.rel (!%p17_p5) target bundleno = 7 (0x7), region = 94 }
 0x192   :  { %645 = vsyncpa [#allocation4], 1 }
 0x193   :  { %647 = vsyncpa [#allocation4 + $0x1], 1 }
 0x194   :  { %648 = vsyncpa [#allocation7], 1 }
 0x195   :  { %649 = vsyncpa [#allocation5], 1 }
 0x196   :  { %651 = vsyncpa [#allocation5 + $0x1], 1 }

// kernel: _lambda_.7
= control target key start
LH: loop header
LB: loop body
LE: loop exit
PB: predicated region body
PF: predicated region fallthrough
CT: control target
= control target key end

     0   :  { %6 = vsyncpa [#allocation3], 0  ;;  %s553_s0 = inlined_call_operand.hbm [shape: f32[2,8,8,128], index: 0, kind: input, shape index: {}]   ;;  %s554_s1 = inlined_call_operand.vmem [shape: f32[2,4,128], index: 1, kind: output, shape index: {}]  }
   0x1   :  { %8 = vsyncpa [#allocation3 + $0x1], 0  ;;  %s429_s6 = smov 0   ;;  %s431_s7 = smov 0  }
   0x2   :  { %s433_s8 = smov 0   ;;  %s435_s9 = smov 0  }
   0x3 LB: > { %s448_s10 = sadd.s32 4294967295, %s414_s9   ;;  %s451_s11 = sadd.s32 1, %s414_s9   ;;  %s414_s9 = sphi %s435_s9, %s561_s9   ;;  %s410_s8 = sphi %s433_s8, %s560_s8   ;;  %s406_s7 = sphi %s431_s7, %s559_s7   ;;  %s402_s6 = sphi %s429_s6, %s558_s6  }
   0x4   : > { %s18_s12 = ssub.s32 %s414_s9, %s451_s11  ;;  %s21_s13 = sadd.s32 1, %s410_s8 }
   0x5   : > { %p19_p0 = scmp.eq.s32.totalorder %s18_s12, 0  ;;  %p28_p1 = scmp.ne.s32.totalorder %s410_s8, %s406_s7 }
   0x6   : > { %p29_p2 = scmp.eq.s32.totalorder %s414_s9, 0  ;;  %p34_p3 = scmp.ne.s32.totalorder %s406_s7, %s402_s6 }
   0x7   : > { %s461_s14 = scalar_select %p19_p0, %s410_s8, %s21_s13  }
   0x8   : > { %p30_p4 = por %p29_p2, %p28_p1  ;;  %p35_p5 = scmp.eq.s32.totalorder %s448_s10, 0 }
   0x9   : > { %p315_p6 = scmp.lt.s32.totalorder %s414_s9, 2  ;;  %s84_s16 = sand.u32 1, %s410_s8  }
   0xa   : > { %p465_p7 = por %p35_p5, %p34_p3  ;;  %s300_s17 = sshll.u32 %s84_s16, 6 }
   0xb   : > { %s308_s18 = sshll.u32 %s414_s9, 10  ;;  %s88_s22 = scalar_lea.vmem [#allocation2], %s300_s17 }
   0xc   : > { %s474_s21 = scalar_lea.hbm %s553_s0, %s308_s18  ;;  %s95_s23 = sshll.u32 %s88_s22, 4  ;;  %s476_s23 = int_to_ptr.vmem [resolvable:$true] %s95_s23 }
   0xd   : > { %p478_p8 = pnand %p315_p6, %p30_p4  ;;  %s483_s25 = scalar_lea.sflag [#allocation3], %s84_s16 }
   0xe   : > { %s350_s26 = scalar_lea.hbm %s474_s21, 1024  ;;  %s355_s29 = scalar_lea.hbm %s553_s0, 2048 }
   0xf   : > { %p351_p10 = scmp.ne.s32.totalorder %s474_s21, %s350_s26  ;;  %p352_p11 = pneg %p478_p8 }
  0x10   : > { %p356_p0 = scmp.lt.u32.totalorder %s474_s21, %s553_s0  ;;  %p357_p1 = scmp.lt.u32.totalorder %s355_s29, %s350_s26 }
  0x11   : > { %p353_p12 = pnand %p352_p11, %p351_p10  ;;  %p359_p3 = scmp.lt.u32.totalorder %s350_s26, %s474_s21 }
  0x12   : > { %p358_p2 = por %p357_p1, %p356_p0 }
  0x13   : > { %p354_p13 = pneg %p353_p12 }
  0x14   : > { %p360_p4 = por %p359_p3, %p358_p2 }
  0x16   : > { %p361_p5 = pnand %p360_p4, %p354_p13 }
  0x18   : > { %364 = shalt.err (!%p361_p5)
}
  0x19   : > { %s365_s3 = scalar_lea.vmem %s476_s23, 1024  ;;  %s416_s4 = smov [#allocation2]  }
  0x1a   : > { %p366_p6 = scmp.ne.s32.totalorder %s476_s23, %s365_s3  ;;  %s370_s5 = sshll.u32 %s416_s4, 4  ;;  %s371_s5 = int_to_ptr.vmem [resolvable:$false] %s370_s5 }
  0x1b   : > { %s372_s6 = scalar_lea.vmem %s371_s5, 2048  ;;  %p373_p9 = scmp.lt.s32.totalorder %s476_s23, %s371_s5 }
  0x1c   : > { %p368_p10 = pnand %p366_p6, %p352_p11  ;;  %p374_p0 = scmp.lt.s32.totalorder %s372_s6, %s365_s3 }
  0x1e   : > { %p369_p12 = pneg %p368_p10  ;;  %p375_p1 = por %p374_p0, %p373_p9 }
  0x20   : > { %p376_p2 = pnand %p375_p1, %p369_p12 }
  0x22   : > { %379 = shalt.err (!%p376_p2)
}
  0x23   : > { %s417_s12 = smov 128   ;;  %s418_s13 = smov 8  }
  0x24   : > { %314 = dma.hbm_to_vmem [thread:$0]  (!%p478_p8), %s474_s21, 1024, %s476_s23, %s483_s25, %s417_s12, %s417_s12, %s418_s13  }
  0x25   : > { %p103_p11 = scmp.lt.s32.totalorder %s414_s9, 3  ;;  %p557_p13 = scmp.ge.s32.totalorder %s414_s9, 1 }
  0x27   : > { %p104_p3 = pnand %p557_p13, %p103_p11 }
  0x28   : > { %s109_s16 = sand.u32 (!%p104_p3), 1, %s406_s7  }
  0x29   : > { %107 = sbr.rel (%p104_p3) target bundleno = 81 (0x51), region = 24  ;;  %s304_s17 = sshll.u32 (!%p104_p3), %s109_s16, 6 }
  0x2a   : > { %s110_s18 = scalar_lea.sflag (!%p104_p3), [#allocation3], %s109_s16  ;;  %s113_s19 = scalar_lea.vmem (!%p104_p3), [#allocation2], %s304_s17 }
  0x30   : > { %397 = dma.done.wait (%p465_p7), %s110_s18, 1024  }
  0x31   : > { %399 = vsyncadd (%p465_p7), %s110_s18, 4294966272  ;;  %vm143_vm0 = vcmask 1043456   ;;  %v135_v0 = vld [vmem:[%s113_s19] sm:$0xff]  ;;  %v136_v1 = vld [vmem:[%s113_s19 + $0x8] sm:$0xff]  ;;  %p131_p7 = scmp.lt.s32.totalorder %s448_s10, 1  ;;  %vm225_vm1 = vcmask 1040384  }
  0x32   : > { %v137_v2 = vld [vmem:[%s113_s19 + $0x10] sm:$0xff]  ;;  %v138_v3 = vld [vmem:[%s113_s19 + $0x18] sm:$0xff]  ;;  %v139_v4 = vld [vmem:[%s113_s19 + $0x20] sm:$0xff]  ;;  %v144_v6 = vsel %vm143_vm0, %v135_v0, 0.0  ;;  %v145_v7 = vsel %vm143_vm0, %v136_v1, 0.0  ;;  %v163_v12 = vrot.slane %v135_v0, 4 }
  0x33   : > { %v140_v5 = vld [vmem:[%s113_s19 + $0x28] sm:$0xff]  ;;  %v147_v8 = vsel %vm143_vm0, %v137_v2, 0.0  ;;  %v141_v9 = vld [vmem:[%s113_s19 + $0x30] sm:$0xff]  ;;  %v146_v10 = vadd.f32 %v145_v7, %v144_v6  ;;  %v149_v11 = vsel %vm143_vm0, %v138_v3, 0.0  ;;  %v164_v13 = vrot.slane %v136_v1, 4  ;;  %v142_v14 = vld [vmem:[%s113_s19 + $0x38] sm:$0xff] }
  0x34   : > { %v165_v15 = vrot.slane %v137_v2, 4  ;;  %v166_v16 = vrot.slane %v138_v3, 4  ;;  %v185_v17 = vsel %vm143_vm0, %v139_v4, 0.0  ;;  %v186_v18 = vsel %vm143_vm0, %v140_v5, 0.0  ;;  %s563_s10 = smov (!%p131_p7, %s448_s10), 1 }
  0x35   : > { %v148_v19 = vadd.f32 %v147_v8, %v146_v10  ;;  %v171_v20 = vsel %vm143_vm0, %v163_v12, 0.0  ;;  %v172_v21 = vsel %vm143_vm0, %v164_v13, 0.0  ;;  %v187_v22 = vadd.f32 %v186_v18, %v185_v17  ;;  %s305_s9 = sshll.u32 %s563_s10, 2 }
  0x36   : > { %v173_v23 = vadd.f32 %v172_v21, %v171_v20  ;;  %v174_v24 = vsel %vm143_vm0, %v165_v15, 0.0  ;;  %v176_v25 = vsel %vm143_vm0, %v166_v16, 0.0  ;;  %v188_v26 = vsel %vm143_vm0, %v141_v9, 0.0  ;;  %s134_s21 = scalar_lea.vmem %s554_s1, %s305_s9 }
  0x37   : > { %v150_v27 = vadd.f32 %v149_v11, %v148_v19  ;;  %v189_v28 = vadd.f32 %v188_v26, %v187_v22  ;;  %v190_v29 = vsel %vm143_vm0, %v142_v14, 0.0  ;;  %v203_v30 = vrot.slane %v139_v4, 4 }
  0x38   : > { %v175_v31 = vadd.f32 %v174_v24, %v173_v23  ;;  %v204_v32 = vrot.slane %v140_v5, 4  ;;  %v205_v33 = vrot.slane %v141_v9, 4  ;;  %v206_v34 = vrot.slane %v142_v14, 4 }
  0x39   : > { %v151_v35 = vrot.slane %v150_v27, 4  ;;  %v191_v36 = vadd.f32 %v190_v29, %v189_v28  ;;  %v211_v37 = vsel %vm143_vm0, %v203_v30, 0.0  ;;  %vm227_vm2 = vcmask 1041408  }
  0x3a   : > { %v177_v38 = vadd.f32 %v176_v25, %v175_v31  ;;  %v212_v39 = vsel %vm143_vm0, %v204_v32, 0.0  ;;  %v214_v40 = vsel %vm143_vm0, %v205_v33, 0.0  ;;  %v216_v45 = vsel %vm143_vm0, %v206_v34, 0.0 }
  0x3b   : > { %v152_v41 = vadd.f32 %v151_v35, %v150_v27  ;;  %v192_v42 = vrot.slane %v191_v36, 4  ;;  %v213_v43 = vadd.f32 %v212_v39, %v211_v37  ;;  %vm229_vm3 = vcmask 1042432  }
  0x3c   : > { %v178_v44 = vrot.slane %v177_v38, 4 }
  0x3d   : > { %v153_v46 = vrot.slane %v152_v41, 2  ;;  %v193_v47 = vadd.f32 %v192_v42, %v191_v36  ;;  %v215_v48 = vadd.f32 %v214_v40, %v213_v43 }
  0x3e   : > { %v179_v49 = vadd.f32 %v178_v44, %v177_v38 }
  0x3f   : > { %v154_v50 = vadd.f32 %v153_v46, %v152_v41  ;;  %v194_v51 = vrot.slane %v193_v47, 2  ;;  %v217_v52 = vadd.f32 %v216_v45, %v215_v48 }
  0x40   : > { %v180_v53 = vrot.slane %v179_v49, 2 }
  0x41   : > { %v155_v54 = vrot.slane %v154_v50, 1  ;;  %v195_v55 = vadd.f32 %v194_v51, %v193_v47  ;;  %v218_v56 = vrot.slane %v217_v52, 4 }
  0x42   : > { %v181_v57 = vadd.f32 %v180_v53, %v179_v49 }
  0x43   : > { %v156_v58 = vadd.f32 %v155_v54, %v154_v50  ;;  %v196_v59 = vrot.slane %v195_v55, 1  ;;  %v219_v60 = vadd.f32 %v218_v56, %v217_v52 }
  0x44   : > { %v182_v61 = vrot.slane %v181_v57, 1 }
  0x45   : > { %v197_v62 = vadd.f32 %v196_v59, %v195_v55  ;;  %v220_v63 = vrot.slane %v219_v60, 2  ;;  %v158_v0 = vmul.f32 0.0625, %v156_v58 }
  0x46   : > { %v183_v1 = vadd.f32 %v182_v61, %v181_v57 }
  0x47   : > { %v221_v2 = vadd.f32 %v220_v63, %v219_v60  ;;  %v198_v4 = vmul.f32 0.0625, %v197_v62 }
  0x48   : > { %v184_v3 = vmul.f32 0.0625, %v183_v1 }
  0x49   : > { %v222_v5 = vrot.slane %v221_v2, 1 }
  0x4a   : > { %v226_v6 = vsel %vm225_vm1, %v158_v0, %v184_v3 }
  0x4b   : > { %v223_v7 = vadd.f32 %v222_v5, %v221_v2  ;;  %v228_v8 = vsel %vm227_vm2, %v226_v6, %v198_v4 }
  0x4d   : > { %v224_v9 = vmul.f32 0.0625, %v223_v7 }
  0x4f   : > { %v230_v10 = vsel %vm229_vm3, %v228_v8, %v224_v9 }
  0x50   : > { %231 = vst [vmem:[%s134_s21] sm:$0xf] %v230_v10 }
  0x51 PF: > { %p11_p8 = scmp.ge.s32.totalorder %s451_s11, 4   ;;  %s558_s6 = smov %s406_s7 }
  0x52   : > { %s559_s7 = smov %s410_s8  ;;  %s560_s8 = smov %s461_s14 }
  0x53   : > { %s561_s9 = smov %s451_s11  ;;  %13 = sbr.rel (!%p11_p8) target bundleno = 3 (0x3), region = 64 }
  0x5a   :  { %251 = vsyncpa [#allocation3], 1 }
  0x5b   :  { %253 = vsyncpa [#allocation3 + $0x1], 1 }

// kernel: _lambda_.6
= control target key start
LH: loop header
LB: loop body
LE: loop exit
PB: predicated region body
PF: predicated region fallthrough
CT: control target
= control target key end

     0   :  { %8 = vsyncpa [#allocation4], 0  ;;  %s722_s0 = inlined_call_operand.hbm [shape: bf16[128,128], index: 0, kind: input, shape index: {}]   ;;  %s723_s1 = inlined_call_operand.hbm [shape: bf16[128,128], index: 1, kind: input, shape index: {}]   ;;  %s724_s2 = inlined_call_operand.hbm [shape: f32[1,128], index: 2, kind: input, shape index: {}]   ;;  %s725_s3 = inlined_call_operand.hbm [shape: f32[128,128], index: 3, kind: output, shape index: {}]  }
   0x1   :  { %9 = vsyncpa [#allocation7], 0 }
   0x2   :  { %10 = vsyncpa [#allocation5], 0  ;;  %s639_s12 = smov [#allocation6]   ;;  %s640_s14 = smov [#allocation3]  }
   0x3   :  { %s28_s13 = sshll.u32 %s639_s12, 4  ;;  %s16_s15 = sshll.u32 %s640_s14, 4  ;;  %s29_s13 = int_to_ptr.vmem [resolvable:$true] %s28_s13  ;;  %s667_s15 = int_to_ptr.vmem [resolvable:$true] %s16_s15 }
   0x4   :  { %s545_s18 = scalar_lea.hbm %s723_s1, 1024 }
   0x5   :  { %p546_p0 = scmp.ne.s32.totalorder %s723_s1, %s545_s18  ;;  %p549_p1 = scmp.lt.u32.totalorder %s545_s18, %s723_s1 }
   0x7   :  { %p551_p2 = pnand %p549_p1, %p546_p0 }
   0x9   :  { %554 = shalt.err (!%p551_p2)
}
   0xa   :  { %s555_s23 = scalar_lea.vmem %s29_s13, 1024  ;;  %p560_p4 = scmp.lt.s32.totalorder %s29_s13, %s29_s13 }
   0xb   :  { %p556_p3 = scmp.ne.s32.totalorder %s29_s13, %s555_s23  ;;  %p561_p5 = scmp.lt.s32.totalorder %s555_s23, %s555_s23 }
   0xd   :  { %p562_p6 = por %p561_p5, %p560_p4 }
   0xf   :  { %p563_p7 = pnand %p562_p6, %p556_p3 }
  0x11   :  { %566 = shalt.err (!%p563_p7)
}
  0x12   :  { %s641_s24 = smov 64   ;;  %s642_s25 = smov 4  }
  0x13   :  { %34 = dma.hbm_to_vmem [thread:$0]  %s723_s1, 1024, %s29_s13, [#allocation7], %s641_s24, %s641_s24, %s642_s25  }
  0x14   :  { %s567_s30 = scalar_lea.hbm %s722_s0, 1024 }
  0x15   :  { %p568_p8 = scmp.ne.s32.totalorder %s722_s0, %s567_s30  ;;  %p571_p9 = scmp.lt.u32.totalorder %s567_s30, %s722_s0 }
  0x17   :  { %p573_p10 = pnand %p571_p9, %p568_p8 }
  0x19   :  { %576 = shalt.err (!%p573_p10)
}
  0x1a   :  { %s577_s8 = scalar_lea.vmem %s667_s15, 1024  ;;  %p582_p12 = scmp.lt.s32.totalorder %s667_s15, %s667_s15 }
  0x1b   :  { %p578_p11 = scmp.ne.s32.totalorder %s667_s15, %s577_s8  ;;  %p583_p13 = scmp.lt.s32.totalorder %s577_s8, %s577_s8 }
  0x1d   :  { %p584_p0 = por %p583_p13, %p582_p12 }
  0x1f   :  { %p585_p1 = pnand %p584_p0, %p578_p11 }
  0x21   :  { %588 = shalt.err (!%p585_p1)
}
  0x22   :  { %22 = dma.hbm_to_vmem [thread:$0]  %s722_s0, 1024, %s667_s15, [#allocation4], %s641_s24, %s641_s24, %s642_s25  }
  0x23   :  { %s643_s10 = smov [#allocation8]   ;;  %s589_s14 = scalar_lea.hbm %s724_s2, 16 }
  0x24   :  { %s41_s11 = sshll.u32 %s643_s10, 4  ;;  %p590_p2 = scmp.ne.s32.totalorder %s724_s2, %s589_s14  ;;  %s42_s11 = int_to_ptr.vmem [resolvable:$true] %s41_s11 }
  0x25   :  { %p593_p3 = scmp.lt.u32.totalorder %s589_s14, %s724_s2 }
  0x27   :  { %p595_p4 = pnand %p593_p3, %p590_p2 }
  0x29   :  { %598 = shalt.err (!%p595_p4)
}
  0x2a   :  { %s599_s20 = scalar_lea.vmem %s42_s11, 16  ;;  %s603_s0 = scalar_lea.vmem %s42_s11, 32 }
  0x2b   :  { %p600_p5 = scmp.ne.s32.totalorder %s42_s11, %s599_s20  ;;  %p604_p6 = scmp.lt.s32.totalorder %s42_s11, %s42_s11 }
  0x2c   :  { %p605_p7 = scmp.lt.s32.totalorder %s603_s0, %s599_s20 }
  0x2e   :  { %p606_p8 = por %p605_p7, %p604_p6 }
  0x30   :  { %p607_p9 = pnand %p606_p8, %p600_p5 }
  0x32   :  { %610 = shalt.err (!%p607_p9)
}
  0x33   :  { %44 = dma.hbm_to_vmem [thread:$0]  %s724_s2, 16, %s42_s11, [#allocation7]  }
  0x34   :  { %633 = dma.done.wait [#allocation4], 1024  }
  0x35   :  { %634 = vsyncadd [#allocation4], 4294966272 }
  0x36   :  { %635 = dma.done.wait [#allocation7], 1040  }
  0x37   :  { %636 = vsyncadd [#allocation7], 4294966256  ;;  %v529_v0 = vld [vmem:[#allocation6] sm:$0xff]   ;;  %v530_v1 = vld [vmem:[#allocation6 + $0x8] sm:$0xff]   ;;  %s644_s2 = smov [#allocation9]  }
  0x38   :  { %473 = vmatprep.subr.bf16.mxu0 %v529_v0  ;;  %505 = vmatprep.subr.bf16.mxu1 %v529_v0  ;;  %v531_v2 = vld [vmem:[#allocation6 + $0x10] sm:$0xff]   ;;  %v532_v3 = vld [vmem:[#allocation6 + $0x18] sm:$0xff]   ;;  %v537_v4 = vld [vmem:[#allocation3] sm:$0xff]   ;;  %s427_s22 = sshll.u32 %s644_s2, 4  ;;  %s428_s22 = int_to_ptr.vmem [resolvable:$true] %s427_s22 }
  0x39   :  { %474 = vmatpush3.bf16.msra.mxu0 %v529_v0  ;;  %513 = vmatpush3.bf16.msra.mxu1 %v529_v0  ;;  %v538_v5 = vld [vmem:[#allocation3 + $0x20] sm:$0xff]   ;;  %v534_v7 = vld [vmem:[#allocation6 + $0x28] sm:$0xff]   ;;  %v535_v8 = vld [vmem:[#allocation6 + $0x30] sm:$0xff]   ;;  %s611_s23 = scalar_lea.vmem %s428_s22, 2048  ;;  %p616_p11 = scmp.lt.s32.totalorder %s428_s22, %s428_s22 }
  0x3a   :  { %475 = vmatprep.subr.bf16.mxu0 %v530_v1  ;;  %506 = vmatprep.subr.bf16.mxu1 %v530_v1  ;;  %v533_v6 = vld [vmem:[#allocation6 + $0x20] sm:$0xff]   ;;  %v536_v9 = vld [vmem:[#allocation6 + $0x38] sm:$0xff]   ;;  %v539_v10 = vld [vmem:[#allocation3 + $0x8] sm:$0xff]   ;;  %p612_p10 = scmp.ne.s32.totalorder %s428_s22, %s611_s23  ;;  %p617_p12 = scmp.lt.s32.totalorder %s611_s23, %s611_s23 }
  0x3b   :  { %489 = vmatprep.mubr.bf16.mxu0 %v537_v4  ;;  %497 = vmatprep.mubr.bf16.mxu1 %v538_v5  ;;  %v540_v11 = vld [vmem:[#allocation3 + $0x28] sm:$0xff]   ;;  %v541_v12 = vld [vmem:[#allocation3 + $0x10] sm:$0xff]   ;;  %v543_v14 = vld [vmem:[#allocation3 + $0x18] sm:$0xff]  }
  0x3c   :  { %v542_v13 = vld [vmem:[#allocation3 + $0x30] sm:$0xff]   ;;  %v544_v15 = vld [vmem:[#allocation3 + $0x38] sm:$0xff]   ;;  %v456_v16 = vld [vmem:[#allocation8] ss:$0 sm:$0xff]  ;;  %p618_p13 = por %p617_p12, %p616_p11 }
  0x3d   :  { %476 = vmatpush3.bf16.msra.mxu0 %v530_v1  ;;  %514 = vmatpush3.bf16.msra.mxu1 %v530_v1 }
  0x3e   :  { %477 = vmatprep.subr.bf16.mxu0 %v531_v2  ;;  %507 = vmatprep.subr.bf16.mxu1 %v531_v2  ;;  %p619_p0 = pnand %p618_p13, %p612_p10 }
  0x41   :  { %478 = vmatpush3.bf16.msra.mxu0 %v531_v2  ;;  %515 = vmatpush3.bf16.msra.mxu1 %v531_v2 }
  0x42   :  { %479 = vmatprep.subr.bf16.mxu0 %v532_v3  ;;  %508 = vmatprep.subr.bf16.mxu1 %v532_v3 }
  0x45   :  { %480 = vmatpush3.bf16.msra.mxu0 %v532_v3  ;;  %516 = vmatpush3.bf16.msra.mxu1 %v532_v3 }
  0x46   :  { %481 = vmatprep.subr.bf16.mxu0 %v533_v6  ;;  %509 = vmatprep.subr.bf16.mxu1 %v533_v6 }
  0x49   :  { %482 = vmatpush3.bf16.msra.mxu0 %v533_v6  ;;  %517 = vmatpush3.bf16.msra.mxu1 %v533_v6 }
  0x4a   :  { %483 = vmatprep.subr.bf16.mxu0 %v534_v7  ;;  %510 = vmatprep.subr.bf16.mxu1 %v534_v7 }
  0x4d   :  { %484 = vmatpush3.bf16.msra.mxu0 %v534_v7  ;;  %518 = vmatpush3.bf16.msra.mxu1 %v534_v7 }
  0x4e   :  { %485 = vmatprep.subr.bf16.mxu0 %v535_v8  ;;  %511 = vmatprep.subr.bf16.mxu1 %v535_v8 }
  0x51   :  { %486 = vmatpush3.bf16.msra.mxu0 %v535_v8  ;;  %519 = vmatpush3.bf16.msra.mxu1 %v535_v8 }
  0x52   :  { %487 = vmatprep.subr.bf16.mxu0 %v536_v9  ;;  %512 = vmatprep.subr.bf16.mxu1 %v536_v9 }
  0x55   :  { %488 = vmatpush3.bf16.msra.mxu0 %v536_v9  ;;  %520 = vmatpush3.bf16.msra.mxu1 %v536_v9 }
  0x58   :  { %490 = vmatmul.mubr.bf16.vlgmr.msra.gmra.mrb[0].mxu0 %v539_v10  ;;  %498 = vmatmul.mubr.bf16.vlgmr.msra.gmra.mrb[0].mxu1 %v540_v11 }
  0x59   :  { %493 = vmatprep.mubr.bf16.mxu0 %v541_v12  ;;  %501 = vmatprep.mubr.bf16.mxu1 %v542_v13 }
  0x60   :  { %494 = vmatmul.mubr.bf16.gmra.mrb[4].mxu0 %v543_v14  ;;  %502 = vmatmul.mubr.bf16.gmra.mrb[4].mxu1 %v544_v15 }
 0x12b   :  { %v491_v17 = vpop.f32.mrb[0].mxu0  ;;  %v499_v18 = vpop.f32.mrb[0].mxu1 }
 0x12c   :  { %v376_v19 = vadd.f32 %v491_v17, %v456_v16  ;;  %v384_v20 = vadd.f32 %v499_v18, %v456_v16  ;;  %v253_v21 = vpop.f32.mrb[1].mxu0  ;;  %v285_v22 = vpop.f32.mrb[1].mxu1 }
 0x12d   :  { %v374_v23 = vadd.f32 %v456_v16, %v253_v21  ;;  %v382_v24 = vadd.f32 %v456_v16, %v285_v22  ;;  %v492_v25 = vpop.f32.mrb[2].mxu0  ;;  %v500_v26 = vpop.f32.mrb[2].mxu1 }
 0x12e   :  { %v392_v27 = vmax.f32 %v376_v19, 0.0  ;;  %v400_v28 = vmax.f32 %v384_v20, 0.0  ;;  %v377_v29 = vadd.f32 %v492_v25, %v456_v16  ;;  %v385_v30 = vadd.f32 %v500_v26, %v456_v16  ;;  %v256_v31 = vpop.f32.mrb[3].mxu0  ;;  %v288_v32 = vpop.f32.mrb[3].mxu1 }
 0x12f   :  { %v390_v33 = vmax.f32 %v374_v23, 0.0  ;;  %v398_v34 = vmax.f32 %v382_v24, 0.0  ;;  %v375_v35 = vadd.f32 %v456_v16, %v256_v31  ;;  %v383_v36 = vadd.f32 %v456_v16, %v288_v32 }
 0x130   :  { %408 = vst [vmem:[#allocation9 + $0x10] sm:$0xff] %v392_v27  ;;  %416 = vst [vmem:[#allocation9 + $0x50] sm:$0xff] %v400_v28  ;;  %v393_v37 = vmax.f32 %v377_v29, 0.0  ;;  %v401_v38 = vmax.f32 %v385_v30, 0.0 }
 0x131   :  { %406 = vst [vmem:[#allocation9] sm:$0xff] %v390_v33  ;;  %414 = vst [vmem:[#allocation9 + $0x40] sm:$0xff] %v398_v34  ;;  %v391_v39 = vmax.f32 %v375_v35, 0.0  ;;  %v399_v40 = vmax.f32 %v383_v36, 0.0 }
 0x132   :  { %409 = vst [vmem:[#allocation9 + $0x18] sm:$0xff] %v393_v37  ;;  %417 = vst [vmem:[#allocation9 + $0x58] sm:$0xff] %v401_v38 }
 0x133   :  { %407 = vst [vmem:[#allocation9 + $0x8] sm:$0xff] %v391_v39  ;;  %415 = vst [vmem:[#allocation9 + $0x48] sm:$0xff] %v399_v40  ;;  %v495_v41 = vpop.f32.mrb[4].mxu0  ;;  %v503_v42 = vpop.f32.mrb[4].mxu1 }
 0x134   :  { %v380_v43 = vadd.f32 %v495_v41, %v456_v16  ;;  %v388_v44 = vadd.f32 %v503_v42, %v456_v16  ;;  %v269_v45 = vpop.f32.mrb[5].mxu0  ;;  %v301_v46 = vpop.f32.mrb[5].mxu1 }
 0x135   :  { %v378_v47 = vadd.f32 %v456_v16, %v269_v45  ;;  %v386_v48 = vadd.f32 %v456_v16, %v301_v46  ;;  %v496_v49 = vpop.f32.mrb[6].mxu0  ;;  %v504_v50 = vpop.f32.mrb[6].mxu1 }
 0x136   :  { %v396_v51 = vmax.f32 %v380_v43, 0.0  ;;  %v404_v52 = vmax.f32 %v388_v44, 0.0  ;;  %v381_v53 = vadd.f32 %v496_v49, %v456_v16  ;;  %v389_v54 = vadd.f32 %v504_v50, %v456_v16  ;;  %v272_v55 = vpop.f32.mrb[7].mxu0  ;;  %v304_v56 = vpop.f32.mrb[7].mxu1 }
 0x137   :  { %v394_v57 = vmax.f32 %v378_v47, 0.0  ;;  %v402_v58 = vmax.f32 %v386_v48, 0.0  ;;  %v379_v59 = vadd.f32 %v456_v16, %v272_v55  ;;  %v387_v60 = vadd.f32 %v456_v16, %v304_v56 }
 0x138   :  { %412 = vst [vmem:[#allocation9 + $0x30] sm:$0xff] %v396_v51  ;;  %420 = vst [vmem:[#allocation9 + $0x70] sm:$0xff] %v404_v52  ;;  %v397_v61 = vmax.f32 %v381_v53, 0.0  ;;  %v405_v62 = vmax.f32 %v389_v54, 0.0 }
 0x139   :  { %410 = vst [vmem:[#allocation9 + $0x20] sm:$0xff] %v394_v57  ;;  %418 = vst [vmem:[#allocation9 + $0x60] sm:$0xff] %v402_v58  ;;  %v395_v63 = vmax.f32 %v379_v59, 0.0  ;;  %v403_v0 = vmax.f32 %v387_v60, 0.0 }
 0x13a   :  { %413 = vst [vmem:[#allocation9 + $0x38] sm:$0xff] %v397_v61  ;;  %421 = vst [vmem:[#allocation9 + $0x78] sm:$0xff] %v405_v62 }
 0x13b   :  { %411 = vst [vmem:[#allocation9 + $0x28] sm:$0xff] %v395_v63  ;;  %419 = vst [vmem:[#allocation9 + $0x68] sm:$0xff] %v403_v0 }
 0x13c   :  { %622 = shalt.err (!%p619_p0)
}
 0x13d   :  { %s623_s26 = scalar_lea.hbm %s725_s3, 2048 }
 0x13e   :  { %p624_p1 = scmp.ne.s32.totalorder %s725_s3, %s623_s26  ;;  %p627_p2 = scmp.lt.u32.totalorder %s623_s26, %s725_s3 }
 0x140   :  { %p629_p3 = pnand %p627_p2, %p624_p1 }
 0x142   :  { %632 = shalt.err (!%p629_p3)
}
 0x143   :  { %s645_s4 = smov 128   ;;  %s646_s5 = smov 8  }
 0x144   :  { %433 = dma.vmem_to_hbm [thread:$0]  %s428_s22, 2048, %s725_s3, [#allocation5], %s645_s4, %s645_s4, %s646_s5  }
 0x145   :  { %637 = dma.done.wait [#allocation5], 2048  }
 0x146   :  { %638 = vsyncadd [#allocation5], 4294965248 }
 0x147   :  { %437 = vsyncpa [#allocation4], 1 }
 0x148   :  { %438 = vsyncpa [#allocation7], 1 }
 0x149   :  { %439 = vsyncpa [#allocation5], 1 }

</bundles_post_ra>
